<compile_context>
chip_gen: v7x
topology: tpu7x:2x2x1
jax: 0.10.0
libtpu: 0.0.40
codegen_flags: <defaults>
</compile_context>

<pallas_src>
import math
import jax
import jax.numpy as jnp
from jax.experimental import pallas as pl
from jax.experimental.pallas import tpu as pltpu

HIDDEN = 1024


def _generator_kernel(z_ref, w1_ref, b1_ref, w2_ref, b2_ref, o_ref):
    # fc1 + ReLU: native bf16 x bf16 -> f32 MXU matmul, f32 bias/activation.
    # Recomputed per output tile; (B, D) @ (D, H) is tiny vs. streaming W2.
    h = jnp.dot(z_ref[...], w1_ref[...], preferred_element_type=jnp.float32)
    h = jnp.maximum(h + b1_ref[...].astype(jnp.float32), 0.0)

    # fc2 tile + Tanh: cast LHS to the (bf16) weight dtype so the MXU sees native
    # bf16 operands; accumulation stays f32.
    y = jnp.dot(h.astype(w2_ref.dtype), w2_ref[...], preferred_element_type=jnp.float32)
    y = y + b2_ref[...].astype(jnp.float32)
    o_ref[...] = jnp.tanh(y).astype(o_ref.dtype)


def _round_up(x, m):
    return (x + m - 1) // m * m


def _sublane(dtype):
    # Second-to-last dim padding granularity: 8 (f32), 16 (bf16), 32 (int8/fp8).
    return max(8, 32 // jnp.dtype(dtype).itemsize)


def _block_bytes(rows, cols, dtype):
    dt = jnp.dtype(dtype)
    return _round_up(rows, _sublane(dt)) * _round_up(cols, 128) * dt.itemsize


def _pick_tile_n(n_pad, hidden, w_itemsize, tile_budget_bytes):
    """Largest 128-multiple divisor of n_pad whose double-buffered W2 tile fits the
    budget, capped at n_pad // 2 so grid_n >= 2 (lets v7x shard the "parallel"
    axis across both TensorCores)."""
    cap = n_pad
    if n_pad >= 256 and (n_pad // 2) % 128 == 0:
        cap = n_pad // 2
    best = 128
    t = 128
    while t <= cap:
        if n_pad % t == 0 and 2 * hidden * t * w_itemsize <= tile_budget_bytes:
            best = t
        t += 128
    return best


def generator_forward(z, w1, b1, w2, b2, output_shape, *, w2_tile_budget_bytes=None):
    """z: (B, latent_dim). Weights stored as (in_features, out_features), bf16.
    Returns (B, *output_shape) in float32."""
    B, D = z.shape
    D1, H = w1.shape
    H2, N = w2.shape
    assert D1 == D and H2 == H
    assert N == int(math.prod(output_shape))

    # Generation-aware VMEM capacity (128 MiB v5e/v6e, 64 MiB v7x; conservative fallback).
    try:
        vmem_cap = int(getattr(pltpu.get_tpu_info(), "vmem_capacity_bytes",
                               64 * 1024 * 1024))
    except Exception:
        vmem_cap = 64 * 1024 * 1024
    if w2_tile_budget_bytes is None:
        w2_tile_budget_bytes = min(8 * 1024 * 1024, vmem_cap // 8)

    # Native-MXU operand dtype: match z to the (bf16) weight dtype.
    z = z.astype(w1.dtype)

    # Pad B to a sublane multiple and N to a lane multiple; sliced off below.
    b_pad = _round_up(max(B, 1), 8)
    n_pad = _round_up(N, 128)
    if b_pad != B:
        z = jnp.pad(z, ((0, b_pad - B), (0, 0)))
    if n_pad != N:
        w2 = jnp.pad(w2, ((0, 0), (0, n_pad - N)))
        b2 = jnp.pad(b2, ((0, 0), (0, n_pad - N)))

    w_item = jnp.dtype(w2.dtype).itemsize
    tile_n = _pick_tile_n(n_pad, H, w_item, w2_tile_budget_bytes)
    grid_n = n_pad // tile_n

    # VMEM usage: resident blocks single-buffered, streamed blocks double-buffered.
    resident = (_block_bytes(b_pad, D, z.dtype)
                + _block_bytes(D, H, w1.dtype)
                + _block_bytes(1, H, b1.dtype))
    streamed = (_block_bytes(H, tile_n, w2.dtype)
                + _block_bytes(1, tile_n, b2.dtype)
                + _block_bytes(b_pad, tile_n, jnp.float32))
    vmem_bytes = resident + 2 * streamed + (2 << 20)  # + scratch headroom
    vmem_limit = int(min(max(vmem_bytes, 4 * 1024 * 1024), (vmem_cap * 3) // 4))

    # Advisory cost estimate (resident blocks fetched once; W2/b2/out streamed once).
    cost = pl.CostEstimate(
        flops=2 * b_pad * (grid_n * D * H + H * n_pad),
        transcendentals=b_pad * n_pad,
        bytes_accessed=(b_pad * D * z.dtype.itemsize
                        + D * H * jnp.dtype(w1.dtype).itemsize
                        + H * jnp.dtype(b1.dtype).itemsize
                        + H * n_pad * w_item
                        + n_pad * w_item
                        + b_pad * n_pad * 4),
    )

    resident_mode = pl.Buffered(1)  # z / W1 / b1 never change across the grid
    out_flat = pl.pallas_call(
        _generator_kernel,
        out_shape=jax.ShapeDtypeStruct((b_pad, n_pad), jnp.float32),
        grid_spec=pltpu.PrefetchScalarGridSpec(
            num_scalar_prefetch=0,
            grid=(grid_n,),
            in_specs=[
                pl.BlockSpec((b_pad, D), lambda j: (0, 0), pipeline_mode=resident_mode),  # z
                pl.BlockSpec((D, H), lambda j: (0, 0), pipeline_mode=resident_mode),      # W1
                pl.BlockSpec((1, H), lambda j: (0, 0), pipeline_mode=resident_mode),      # b1
                pl.BlockSpec((H, tile_n), lambda j: (0, j)),   # W2, streamed over out features
                pl.BlockSpec((1, tile_n), lambda j: (0, j)),   # b2, streamed over out features
            ],
            out_specs=pl.BlockSpec((b_pad, tile_n), lambda j: (0, j)),
        ),
        compiler_params=pltpu.CompilerParams(
            dimension_semantics=("parallel",),
            vmem_limit_bytes=vmem_limit,
        ),
        cost_estimate=cost,
    )(z, w1, b1, w2, b2)

    # TODO(synk): emit bf16 output once B is large enough that writeback matters.
    out_flat = out_flat[:B, :N]
    return out_flat.reshape((B,) + tuple(output_shape))


def init_params(key, latent_dim, output_shape, param_dtype=jnp.bfloat16):
    """PyTorch nn.Linear default init: U(-1/sqrt(fan_in), 1/sqrt(fan_in)).
    Weights stored in bf16 (halves HBM traffic); kernel accumulation stays f32."""
    out_features = int(math.prod(output_shape))
    k1, k2, k3, k4 = jax.random.split(key, 4)

    bound1 = 1.0 / math.sqrt(latent_dim)
    w1 = jax.random.uniform(k1, (latent_dim, HIDDEN), jnp.float32, -bound1, bound1)
    b1 = jax.random.uniform(k2, (1, HIDDEN), jnp.float32, -bound1, bound1)

    bound2 = 1.0 / math.sqrt(HIDDEN)
    w2 = jax.random.uniform(k3, (HIDDEN, out_features), jnp.float32, -bound2, bound2)
    b2 = jax.random.uniform(k4, (1, out_features), jnp.float32, -bound2, bound2)
    return (w1.astype(param_dtype), b1.astype(param_dtype),
            w2.astype(param_dtype), b2.astype(param_dtype))


if __name__ == "__main__":
    latent_dim = 32
    output_shape = (4, 16, 16)   # prod = 1024
    batch = 2                    # TODO(synk): batch many latents (B >= 128) to make fc2 MXU-bound

    key = jax.random.PRNGKey(0)
    kz, kp = jax.random.split(key)
    z = jax.random.normal(kz, (batch, latent_dim), jnp.float32)
    w1, b1, w2, b2 = init_params(kp, latent_dim, output_shape)

    out = generator_forward(z, w1, b1, w2, b2, output_shape)
    out = jax.block_until_ready(out)

    # Reference check in plain JAX with the same bf16-operand / f32-accumulation semantics.
    zf = z.astype(jnp.bfloat16).astype(jnp.float32)
    w1f, b1f, w2f, b2f = (a.astype(jnp.float32) for a in (w1, b1, w2, b2))
    h_ref = jnp.maximum(zf @ w1f + b1f, 0.0)
    h_ref = h_ref.astype(jnp.bfloat16).astype(jnp.float32)
    ref = jnp.tanh(h_ref @ w2f + b2f).reshape(out.shape)

    assert out.shape == (batch,) + tuple(output_shape)
    assert jnp.allclose(out, ref, atol=2e-3, rtol=2e-3)

    print("KERNEL_OK")
</pallas_src>

<mosaic_0001>
module attributes {stable_mosaic.version = 11 : i64} {
  func.func @_generator_kernel(%arg0: i32, %arg1: memref<8x32xbf16, #tpu.memory_space<vmem>>, %arg2: memref<32x1024xbf16, #tpu.memory_space<vmem>>, %arg3: memref<1x1024xbf16, #tpu.memory_space<vmem>>, %arg4: memref<1024x512xbf16, #tpu.memory_space<vmem>>, %arg5: memref<1x512xbf16, #tpu.memory_space<vmem>>, %arg6: memref<8x512xf32, #tpu.memory_space<vmem>>) attributes {dimension_semantics = [#tpu.dimension_semantics<parallel>], iteration_bounds = array<i64: 2>, scalar_prefetch = 0 : i64, scratch_operands = 0 : i64, tpu.core_type = #tpu.core_type<tc>, window_params = [{pipeline_mode = #tpu.pipeline_mode<synchronous>, transform_indices = @transform_0, window_bounds = array<i64: 8, 32>}, {pipeline_mode = #tpu.pipeline_mode<synchronous>, transform_indices = @transform_1, window_bounds = array<i64: 32, 1024>}, {pipeline_mode = #tpu.pipeline_mode<synchronous>, transform_indices = @transform_2, window_bounds = array<i64: 1, 1024>}, {transform_indices = @transform_3, window_bounds = array<i64: 1024, 512>}, {transform_indices = @transform_4, window_bounds = array<i64: 1, 512>}, {transform_indices = @transform_5, window_bounds = array<i64: 8, 512>}]} {
    %c0 = arith.constant 0 : index
    %c0_0 = arith.constant 0 : index
    %0 = vector.load %arg1[%c0, %c0_0] : memref<8x32xbf16, #tpu.memory_space<vmem>>, vector<8x32xbf16>
    %c0_1 = arith.constant 0 : index
    %c0_2 = arith.constant 0 : index
    %1 = vector.load %arg2[%c0_1, %c0_2] : memref<32x1024xbf16, #tpu.memory_space<vmem>>, vector<32x1024xbf16>
    %cst = arith.constant dense<0.000000e+00> : vector<8x1024xf32>
    %2 = tpu.matmul %0, %1, %cst {dimension_numbers = #tpu.dot_dimension_numbers<[1], [0], [0], [1], [0, 0, 1, 1], [], []>} : vector<8x32xbf16>, vector<32x1024xbf16>, vector<8x1024xf32> -> vector<8x1024xf32>
    %c0_3 = arith.constant 0 : index
    %c0_4 = arith.constant 0 : index
    %3 = vector.load %arg3[%c0_3, %c0_4] : memref<1x1024xbf16, #tpu.memory_space<vmem>>, vector<1x1024xbf16>
    %4 = arith.extf %3 : vector<1x1024xbf16> to vector<1x1024xf32>
    %5 = vector.broadcast %4 : vector<1x1024xf32> to vector<8x1024xf32>
    %6 = arith.addf %2, %5 : vector<8x1024xf32>
    %cst_5 = arith.constant 0.000000e+00 : f32
    %7 = vector.broadcast %cst_5 : f32 to vector<8x1024xf32>
    %8 = arith.maximumf %6, %7 : vector<8x1024xf32>
    %9 = arith.truncf %8 : vector<8x1024xf32> to vector<8x1024xbf16>
    %c0_6 = arith.constant 0 : index
    %c0_7 = arith.constant 0 : index
    %10 = vector.load %arg4[%c0_6, %c0_7] : memref<1024x512xbf16, #tpu.memory_space<vmem>>, vector<1024x512xbf16>
    %cst_8 = arith.constant dense<0.000000e+00> : vector<8x512xf32>
    %11 = tpu.matmul %9, %10, %cst_8 {dimension_numbers = #tpu.dot_dimension_numbers<[1], [0], [0], [1], [0, 0, 1, 1], [], []>} : vector<8x1024xbf16>, vector<1024x512xbf16>, vector<8x512xf32> -> vector<8x512xf32>
    %c0_9 = arith.constant 0 : index
    %c0_10 = arith.constant 0 : index
    %12 = vector.load %arg5[%c0_9, %c0_10] : memref<1x512xbf16, #tpu.memory_space<vmem>>, vector<1x512xbf16>
    %13 = arith.extf %12 : vector<1x512xbf16> to vector<1x512xf32>
    %14 = vector.broadcast %13 : vector<1x512xf32> to vector<8x512xf32>
    %15 = arith.addf %11, %14 : vector<8x512xf32>
    %16 = math.tanh %15 : vector<8x512xf32>
    %c0_11 = arith.constant 0 : index
    %c0_12 = arith.constant 0 : index
    %17 = vector.load %arg6[%c0_11, %c0_12] : memref<8x512xf32, #tpu.memory_space<vmem>>, vector<8x512xf32>
    tpu.vector_store %arg6[%c0_11, %c0_12], %16 {strides = array<i32>} : memref<8x512xf32, #tpu.memory_space<vmem>>, vector<8x512xf32>,
    return
  }
  func.func @transform_0(%arg0: i32) -> (i32, i32) {
    %c0_i32 = arith.constant 0 : i32
    %c0_i32_0 = arith.constant 0 : i32
    %c0_i32_1 = arith.constant 0 : i32
    return %c0_i32, %c0_i32_0 : i32, i32
  }
  func.func @transform_1(%arg0: i32) -> (i32, i32) {
    %c0_i32 = arith.constant 0 : i32
    %c0_i32_0 = arith.constant 0 : i32
    %c0_i32_1 = arith.constant 0 : i32
    return %c0_i32, %c0_i32_0 : i32, i32
  }
  func.func @transform_2(%arg0: i32) -> (i32, i32) {
    %c0_i32 = arith.constant 0 : i32
    %c0_i32_0 = arith.constant 0 : i32
    %c0_i32_1 = arith.constant 0 : i32
    return %c0_i32, %c0_i32_0 : i32, i32
  }
  func.func @transform_3(%arg0: i32) -> (i32, i32) {
    %c0_i32 = arith.constant 0 : i32
    %c0_i32_0 = arith.constant 0 : i32
    return %c0_i32, %arg0 : i32, i32
  }
  func.func @transform_4(%arg0: i32) -> (i32, i32) {
    %c0_i32 = arith.constant 0 : i32
    %c0_i32_0 = arith.constant 0 : i32
    return %c0_i32, %arg0 : i32, i32
  }
  func.func @transform_5(%arg0: i32) -> (i32, i32) {
    %c0_i32 = arith.constant 0 : i32
    %c0_i32_0 = arith.constant 0 : i32
    return %c0_i32, %arg0 : i32, i32
  }
}

</mosaic_0001>

<bundles_post_ra>
// kernel: tpu_custom_call.1
= control target key start
LH: loop header
LB: loop body
LE: loop exit
PB: predicated region body
PF: predicated region fallthrough
CT: control target
= control target key end

     0   :  { %s4411_s0 = inlined_call_operand.hbm [shape: bf16[8,32], index: 0, kind: input, shape index: {}]   ;;  %s4412_s1 = inlined_call_operand.hbm [shape: bf16[32,1024], index: 1, kind: input, shape index: {}]   ;;  %s4413_s2 = inlined_call_operand.hbm [shape: bf16[1,1024], index: 2, kind: input, shape index: {}]   ;;  %s4414_s3 = inlined_call_operand.hbm [shape: bf16[1024,1024], index: 3, kind: input, shape index: {}]   ;;  %s4415_s4 = inlined_call_operand.hbm [shape: bf16[1,1024], index: 4, kind: input, shape index: {}]   ;;  %s4416_s5 = inlined_call_operand.hbm [shape: f32[8,1024], index: 5, kind: output, shape index: {}]  }
   0x1   :  { %4431 = sst [smem:[#allocation20_spill]] %s4412_s1 }
   0x2   :  { %4432 = sst [smem:[#allocation21_spill]] %s4414_s3 }
   0x3   :  { %10 = vsyncpa [#allocation3], 0 }
   0x4   :  { %11 = vsyncpa [#allocation6], 0 }
   0x5   :  { %12 = vsyncpa [#allocation9], 0 }
   0x6   :  { %14 = vsyncpa [#allocation9 + $0x1], 0 }
   0x7   :  { %15 = vsyncpa [#allocation4], 0 }
   0x8   :  { %17 = vsyncpa [#allocation4 + $0x1], 0  ;;  %s3798_s18 = smov 0   ;;  %s3800_s19 = smov 0  }
   0x9   :  { %s3802_s20 = smov 0   ;;  %s3804_s21 = smov 0  }
   0xa LB: > { %4433 = sst [smem:[#allocation16_spill]] %s3743_s18  ;;  %s3819_s22 = sadd.s32 4294967295, %s3755_s21   ;;  %s3755_s21 = sphi %s3804_s21, %s4465_s21   ;;  %s3751_s20 = sphi %s3802_s20, %s4469_s20   ;;  %s3747_s19 = sphi %s3800_s19, %s4468_s19   ;;  %s3743_s18 = sphi %s3798_s18, %s4467_s18  }
   0xb   : > { %s2727_s23 = sadd.s32 4294967294, %s3755_s21   ;;  %s3823_s24 = sadd.s32 1, %s3755_s21  }
   0xc   : > { %4434 = sst [smem:[#allocation17_spill]] %s3823_s24  ;;  %s93_s25 = sadd.s32 1, %s3751_s20 }
   0xd   : > { %s90_s26 = ssub.s32 %s3755_s21, %s3823_s24  ;;  %p100_p0 = scmp.ne.s32.totalorder %s3751_s20, %s3747_s19 }
   0xe   : > { %p91_p1 = scmp.eq.s32.totalorder %s90_s26, 0  ;;  %p101_p2 = scmp.eq.s32.totalorder %s3755_s21, 0 }
   0xf   : > { %p106_p3 = scmp.ne.s32.totalorder %s3747_s19, %s3743_s18  ;;  %p4417_p4 = scmp.eq.s32.totalorder %s3819_s22, 0 }
  0x10   : > { %s3835_s27 = scalar_select %p91_p1, %s3751_s20, %s93_s25  }
  0x11   : > { %p3837_p5 = por %p101_p2, %p100_p0  ;;  %p3843_p6 = por %p4417_p4, %p106_p3 }
  0x12   : > { %4435 = sst [smem:[#allocation18_spill]] %s3835_s27  ;;  %p156_p7 = scmp.eq.s32.totalorder %s3819_s22, 1 }
  0x13   : > { %s4436_s28 = scalar_select %p3837_p5, 1, 0 }
  0x14   : > { %s4437_s29 = scalar_select %p3843_p6, 1, 0 }
  0x15   : > { %p162_p8 = scmp.eq.s32.totalorder %s2727_s23, 1  ;;  %p2728_p9 = scmp.ge.s32.totalorder %s3755_s21, 1 }
  0x16   : > { %p169_p10 = scmp.lt.s32.totalorder %s3755_s21, 3  ;;  %p3850_p11 = por %p156_p7, %p100_p0 }
  0x17   : > { %p3854_p12 = por %p162_p8, %p106_p3  ;;  %s3757_s8 = smov [#allocation5]  }
  0x18   : > { %s4438_s30 = scalar_select %p3850_p11, 1, 0 }
  0x19   : > { %s4439_s6 = scalar_select %p3854_p12, 1, 0 }
  0x1a   : > { %p3858_p13 = pnand %p2728_p9, %p169_p10  ;;  %s192_s9 = sshll.u32 %s3757_s8, 4  ;;  %s193_s9 = int_to_ptr.vmem [resolvable:$true] %s192_s9 }
  0x1b   : > { %4440 = sst [smem:[#allocation19_spill]] %s4439_s6  ;;  %s217_s11 = sand.u32 1, %s3755_s21  }
  0x1c   : > { %s4441_s7 = scalar_select %p3858_p13, 1, 0 }
  0x1d   : > { %p3076_p1 = pneg %p3858_p13  ;;  %s4443_s1 = sld [smem:[#allocation20_spill]] }
  0x1f   : > { %p3866_p2 = pnand %p3076_p1, %p4417_p4 }
  0x21   : > { %s4442_s10 = scalar_select %p3866_p2, 1, 0 }
  0x22   : > { %p3881_p8 = pneg %p3866_p2 }
  0x23   : > { %s3537_s14 = scalar_lea.hbm %s4443_s1, 2048 }
  0x24   : > { %p3538_p7 = scmp.ne.s32.totalorder %s4443_s1, %s3537_s14  ;;  %p3544_p1 = scmp.lt.u32.totalorder %s3537_s14, %s4443_s1 }
  0x26   : > { %p3540_p9 = pnand %p3881_p8, %p3538_p7 }
  0x28   : > { %p3541_p10 = pneg %p3540_p9 }
  0x2a   : > { %p3546_p0 = pnand %p3544_p1, %p3541_p10 }
  0x2c   : > { %3549 = shalt.err (!%p3546_p0)
}
  0x2d   : > { %s3550_s26 = scalar_lea.vmem %s193_s9, 2048  ;;  %p3558_p11 = scmp.lt.s32.totalorder %s193_s9, %s193_s9 }
  0x2e   : > { %p3551_p4 = scmp.ne.s32.totalorder %s193_s9, %s3550_s26  ;;  %p3559_p6 = scmp.lt.s32.totalorder %s3550_s26, %s3550_s26 }
  0x30   : > { %p3553_p3 = pnand %p3551_p4, %p3881_p8  ;;  %p3560_p13 = por %p3559_p6, %p3558_p11 }
  0x32   : > { %p3554_p12 = pneg %p3553_p3 }
  0x34   : > { %p3561_p5 = pnand %p3560_p13, %p3554_p12 }
  0x36   : > { %3564 = shalt.err (!%p3561_p5)
}
  0x37   : > { %s3758_s8 = smov 512   ;;  %s3759_s12 = smov 32  }
  0x38   : > { %3082 = dma.hbm_to_vmem [thread:$0]  (!%p3866_p2), %s4443_s1, 2048, %s193_s9, [#allocation6], %s3758_s8, %s3758_s8, %s3759_s12  }
  0x39   : > { %p4445_p4 = scmp.ne.s32.totalorder %s4436_s28, 0  ;;  %p4446_p0 = scmp.lt.s32.totalorder %s3755_s21, 2 }
  0x3a   : > { %s4423_s16 = sand.u32 1, %s3751_s20   ;;  %s3027_s25 = sshll.u32 %s3755_s21, 8 }
  0x3b   : > { %p3903_p6 = pnand %p4446_p0, %p4445_p4  ;;  %s2733_s23 = sshll.u32 %s4423_s16, 11 }
  0x3c   : > { %s4448_s3 = sld [smem:[#allocation21_spill]]  ;;  %s221_s28 = scalar_lea.vmem [#allocation8], %s2733_s23 }
  0x3d   : > { %s4447_s15 = scalar_select %p3903_p6, 1, 0 }
  0x3e   : > { %s228_s9 = sshll.u32 %s221_s28, 4  ;;  %s3918_s12 = scalar_lea.sflag [#allocation9], %s217_s11  ;;  %s3916_s9 = int_to_ptr.vmem [resolvable:$true] %s228_s9 }
  0x3f   : > { %p4428_p11 = pneg %p3903_p6 }
  0x42   : > { %s3914_s24 = scalar_lea.hbm %s4448_s3, %s3027_s25  ;;  %s3570_s25 = scalar_lea.hbm %s4448_s3, 65536 }
  0x43   : > { %s3565_s13 = scalar_lea.hbm %s3914_s24, 32768  ;;  %p3571_p3 = scmp.lt.u32.totalorder %s3914_s24, %s4448_s3 }
  0x44   : > { %p3566_p5 = scmp.ne.s32.totalorder %s3914_s24, %s3565_s13  ;;  %p3572_p7 = scmp.lt.u32.totalorder %s3570_s25, %s3565_s13 }
  0x45   : > { %p3574_p10 = scmp.lt.u32.totalorder %s3565_s13, %s3914_s24 }
  0x46   : > { %p3568_p12 = pnand %p4428_p11, %p3566_p5  ;;  %p3573_p9 = por %p3572_p7, %p3571_p3 }
  0x48   : > { %p3569_p13 = pneg %p3568_p12  ;;  %p3575_p1 = por %p3574_p10, %p3573_p9 }
  0x4a   : > { %p3576_p4 = pnand %p3575_p1, %p3569_p13 }
  0x4c   : > { %3579 = shalt.err (!%p3576_p4)
}
  0x4d   : > { %s3580_s11 = scalar_lea.vmem %s3916_s9, 32768  ;;  %s3760_s23 = smov [#allocation8]  }
  0x4e   : > { %p3581_p0 = scmp.ne.s32.totalorder %s3916_s9, %s3580_s11  ;;  %s3585_s28 = sshll.u32 %s3760_s23, 4  ;;  %s3586_s28 = int_to_ptr.vmem [resolvable:$false] %s3585_s28 }
  0x4f   : > { %s3587_s16 = scalar_lea.vmem %s3586_s28, 65536  ;;  %p3588_p2 = scmp.lt.s32.totalorder %s3916_s9, %s3586_s28 }
  0x50   : > { %p3583_p5 = pnand %p3581_p0, %p4428_p11  ;;  %p3589_p3 = scmp.lt.s32.totalorder %s3587_s16, %s3580_s11 }
  0x52   : > { %p3584_p12 = pneg %p3583_p5  ;;  %p3590_p7 = por %p3589_p3, %p3588_p2 }
  0x54   : > { %p3591_p9 = pnand %p3590_p7, %p3584_p12 }
  0x56   : > { %3594 = shalt.err (!%p3591_p9)
}
  0x57   : > { %s3761_s13 = smov 256   ;;  %s3762_s27 = smov 16  }
  0x58   : > { %3089 = dma.hbm_to_vmem [thread:$0]  (!%p3903_p6), %s3914_s24, 32768, %s3916_s9, %s3918_s12, %s3758_s8, %s3761_s13, %s3762_s27  }
  0x59   : > { %s3763_s14 = smov [#allocation2]   ;;  %s3764_s26 = smov [#allocation7]  }
  0x5a   : > { %s182_s25 = sshll.u32 %s3763_s14, 4  ;;  %s206_s23 = sshll.u32 %s3764_s26, 4  ;;  %s183_s25 = int_to_ptr.vmem [resolvable:$true] %s182_s25  ;;  %s207_s23 = int_to_ptr.vmem [resolvable:$true] %s206_s23 }
  0x5b   : > { %s3595_s16 = scalar_lea.hbm %s4411_s0, 64 }
  0x5c   : > { %p3596_p2 = scmp.ne.s32.totalorder %s4411_s0, %s3595_s16  ;;  %p3602_p1 = scmp.lt.u32.totalorder %s3595_s16, %s4411_s0 }
  0x5e   : > { %p3598_p13 = pnand %p3596_p2, %p3881_p8 }
  0x60   : > { %p3599_p10 = pneg %p3598_p13 }
  0x62   : > { %p3604_p4 = pnand %p3602_p1, %p3599_p10 }
  0x64   : > { %3607 = shalt.err (!%p3604_p4)
}
  0x65   : > { %s3608_s24 = scalar_lea.vmem %s183_s25, 64  ;;  %p3616_p3 = scmp.lt.s32.totalorder %s183_s25, %s183_s25 }
  0x66   : > { %p3609_p0 = scmp.ne.s32.totalorder %s183_s25, %s3608_s24  ;;  %p3617_p7 = scmp.lt.s32.totalorder %s3608_s24, %s3608_s24 }
  0x68   : > { %p3611_p5 = pnand %p3609_p0, %p3881_p8  ;;  %p3618_p9 = por %p3617_p7, %p3616_p3 }
  0x6a   : > { %p3612_p12 = pneg %p3611_p5 }
  0x6c   : > { %p3619_p11 = pnand %p3618_p9, %p3612_p12 }
  0x6e   : > { %3622 = shalt.err (!%p3619_p11)
}
  0x6f   : > { %p4449_p2 = scmp.ne.s32.totalorder %s4442_s10, 0  ;;  %s4450_s18 = sand.u32 1, %s3751_s20  }
  0x70   : > { %s2736_s6 = sshll.u32 %s4450_s18, 2  ;;  %s3623_s13 = scalar_lea.hbm %s4413_s2, 128 }
  0x71   : > { %3079 = dma.hbm_to_vmem [thread:$0]  (!%p4449_p2), %s4411_s0, 64, %s183_s25, [#allocation3]  }
  0x72   : > { %p3624_p13 = scmp.ne.s32.totalorder %s4413_s2, %s3623_s13  ;;  %p3630_p1 = scmp.lt.u32.totalorder %s3623_s13, %s4413_s2 }
  0x74   : > { %p3626_p11 = pnand %p3624_p13, %p3881_p8 }
  0x76   : > { %p3627_p10 = pneg %p3626_p11 }
  0x78   : > { %p3632_p4 = pnand %p3630_p1, %p3627_p10 }
  0x7a   : > { %3635 = shalt.err (!%p3632_p4)
}
  0x7b   : > { %s3636_s25 = scalar_lea.vmem %s207_s23, 128  ;;  %p3644_p3 = scmp.lt.s32.totalorder %s207_s23, %s207_s23 }
  0x7c   : > { %p3637_p0 = scmp.ne.s32.totalorder %s207_s23, %s3636_s25  ;;  %p3645_p7 = scmp.lt.s32.totalorder %s3636_s25, %s3636_s25 }
  0x7e   : > { %p3639_p5 = pnand %p3637_p0, %p3881_p8  ;;  %p3646_p9 = por %p3645_p7, %p3644_p3 }
  0x80   : > { %p3640_p12 = pneg %p3639_p5 }
  0x82   : > { %p3647_p6 = pnand %p3646_p9, %p3640_p12 }
  0x84   : > { %3650 = shalt.err (!%p3647_p6)
}
  0x85   : > { %3085 = dma.hbm_to_vmem [thread:$0]  (!%p4449_p2), %s4413_s2, 128, %s207_s23, [#allocation6]  }
  0x86   : > { %s3028_s24 = sshll.u32 %s3755_s21, 6  ;;  %s242_s18 = scalar_lea.vmem [#allocation10], %s2736_s6 }
  0x87   : > { %s3989_s17 = scalar_lea.hbm %s4415_s4, %s3028_s24  ;;  %s250_s8 = sshll.u32 %s242_s18, 4  ;;  %s251_s8 = int_to_ptr.vmem [resolvable:$true] %s250_s8 }
  0x88   : > { %s3651_s10 = scalar_lea.hbm %s3989_s17, 64  ;;  %p4451_p6 = scmp.ne.s32.totalorder %s4447_s15, 0 }
  0x89   : > { %p3652_p8 = scmp.ne.s32.totalorder %s3989_s17, %s3651_s10  ;;  %s3656_s13 = scalar_lea.hbm %s4415_s4, 128 }
  0x8a   : > { %p4452_p13 = pneg %p4451_p6  ;;  %p3657_p2 = scmp.lt.u32.totalorder %s3989_s17, %s4415_s4 }
  0x8b   : > { %p3658_p1 = scmp.lt.u32.totalorder %s3656_s13, %s3651_s10  ;;  %p3660_p0 = scmp.lt.u32.totalorder %s3651_s10, %s3989_s17 }
  0x8c   : > { %p3654_p11 = pnand %p3652_p8, %p4452_p13 }
  0x8d   : > { %p3659_p4 = por %p3658_p1, %p3657_p2 }
  0x8e   : > { %p3655_p10 = pneg %p3654_p11 }
  0x8f   : > { %p3661_p5 = por %p3660_p0, %p3659_p4 }
  0x91   : > { %p3662_p12 = pnand %p3661_p5, %p3655_p10 }
  0x93   : > { %3665 = shalt.err (!%p3662_p12)
}
  0x94   : > { %s3666_s6 = scalar_lea.vmem %s251_s8, 64  ;;  %p4453_p7 = pmov %p4452_p13 }
  0x95   : > { %p3667_p3 = scmp.ne.s32.totalorder %s251_s8, %s3666_s6  ;;  %s3765_s26 = smov [#allocation10]  }
  0x96   : > { %s3671_s28 = sshll.u32 %s3765_s26, 4  ;;  %s3672_s28 = int_to_ptr.vmem [resolvable:$false] %s3671_s28 }
  0x97   : > { %p3669_p9 = pnand %p3667_p3, %p4453_p7  ;;  %s3673_s25 = scalar_lea.vmem %s3672_s28, 128 }
  0x98   : > { %p3674_p13 = scmp.lt.s32.totalorder %s251_s8, %s3672_s28  ;;  %p3675_p11 = scmp.lt.s32.totalorder %s3673_s25, %s3666_s6 }
  0x99   : > { %p3670_p8 = pneg %p3669_p9 }
  0x9a   : > { %p3676_p1 = por %p3675_p11, %p3674_p13 }
  0x9c   : > { %p3677_p2 = pnand %p3676_p1, %p3670_p8 }
  0x9e   : > { %3680 = shalt.err (!%p3677_p2)
}
  0x9f   : > { %3092 = dma.hbm_to_vmem [thread:$0]  (!%p4451_p6), %s3989_s17, 64, %s251_s8, %s3918_s12  }
  0xa0   : > { %p4454_p10 = scmp.ne.s32.totalorder %s4441_s7, 0 }
  0xa1   : > { %p4455_p4 = scmp.eq.s32.totalorder (!%p4454_p10), %s3819_s22, 0 }
  0xa2   : > { %259 = sbr.rel (%p4454_p10) target bundleno = 845 (0x34d), region = 40 }
  0xa9   : > { %3726 = dma.done.wait (%p4455_p4), [#allocation3], 64   ;;  %p4456_p0 = pmov %p4455_p4 }
  0xab   : > { %3728 = vsyncadd (%p4456_p0), [#allocation3], 4294967232  ;;  %p4457_p5 = pmov %p4456_p0 }
  0xac   : > { %p4458_p12 = pmov %p4456_p0 }
  0xad   : > { %3730 = dma.done.wait (%p4457_p5), [#allocation6], 2176  }
  0xae   : > { %3732 = vsyncadd (%p4458_p12), [#allocation6], 4294965120  ;;  %s273_s15 = sand.u32 1, %s3819_s22   ;;  %s4023_s12 = sand.u32 1, %s3747_s19  }
  0xaf   : > { %s2743_s7 = sshll.u32 %s4023_s12, 11  ;;  %s274_s11 = scalar_lea.sflag [#allocation9], %s273_s15 }
  0xb0   : > { %s4026_s16 = scalar_lea.vmem [#allocation8], %s2743_s7  ;;  %p4459_p6 = scmp.ne.s32.totalorder %s4437_s29, 0 }
  0xb2   : > { %3734 = dma.done.wait (%p4459_p6), %s274_s11, 32832  }
  0xb3   : > { %3736 = vsyncadd (%p4459_p6), %s274_s11, 4294934464  ;;  %v3766_v0 = vmov 0   ;;  %v323_v1 = vld [vmem:[#allocation5] sm:$0xff]  ;;  %v324_v7 = vld [vmem:[#allocation5 + $0x8] sm:$0xff]  ;;  %vm496_vm0 = vcmask 261120   ;;  %s2744_s29 = sshll.u32 %s4023_s12, 2 }
  0xb4   : > { %532 = vmatprep.mubr.bf16.mxu0 %v3766_v0  ;;  %573 = vmatprep.mubr.bf16.mxu1 %v3766_v0  ;;  %v327_v2 = vld [vmem:[#allocation5 + $0x20] sm:$0xff]  ;;  %v328_v9 = vld [vmem:[#allocation5 + $0x28] sm:$0xff]  ;;  %v325_v15 = vld [vmem:[#allocation5 + $0x10] sm:$0xff]  ;;  %s286_s24 = scalar_lea.vmem [#allocation10], %s2744_s29  ;;  %s2745_s1 = sshll.u32 %s4023_s12, 5 }
  0xb5   : > { %v331_v3 = vld [vmem:[#allocation5 + $0x40] sm:$0xff]  ;;  %v2747_v4 = vcombine.high %v323_v1, %v327_v2  ;;  %v2746_v5 = vcombine.low %v323_v1, %v327_v2  ;;  %v332_v10 = vld [vmem:[#allocation5 + $0x48] sm:$0xff]  ;;  %v2749_v12 = vcombine.high %v324_v7, %v328_v9  ;;  %v2748_v13 = vcombine.low %v324_v7, %v328_v9  ;;  %v329_v16 = vld [vmem:[#allocation5 + $0x30] sm:$0xff]  ;;  %s3029_s3 = sshll.u32 %s3819_s22, 9  ;;  %s317_s17 = scalar_lea.vmem [#allocation11], %s2745_s1 }
  0xb6   : > { %v335_v6 = vld [vmem:[#allocation5 + $0x60] sm:$0xff]  ;;  %v336_v11 = vld [vmem:[#allocation5 + $0x68] sm:$0xff]  ;;  %v326_v18 = vld [vmem:[#allocation5 + $0x18] sm:$0xff]  ;;  %v2751_v20 = vcombine.high %v325_v15, %v329_v16  ;;  %v2750_v27 = vcombine.low %v325_v15, %v329_v16  ;;  %s2606_s18 = sshll.u32 %s317_s17, 4  ;;  %s4367_s23 = scalar_lea.hbm %s4416_s5, %s3029_s3  ;;  %s4369_s18 = int_to_ptr.vmem [resolvable:$true] %s2606_s18 }
  0xb7   : > { %v2755_v8 = vcombine.high %v331_v3, %v335_v6  ;;  %500 = vmatprep.subr.bf16.mxu0 %v2747_v4  ;;  %v2757_v14 = vcombine.high %v332_v10, %v336_v11  ;;  %v2754_v17 = vcombine.low %v331_v3, %v335_v6  ;;  %v330_v19 = vld [vmem:[#allocation5 + $0x38] sm:$0xff]  ;;  %541 = vmatprep.subr.bf16.mxu1 %v2749_v12  ;;  %v333_v23 = vld [vmem:[#allocation5 + $0x50] sm:$0xff]  ;;  %s2592_s22 = scalar_lea.sflag [#allocation4], %s4023_s12  ;;  %s3681_s9 = scalar_lea.vmem %s4369_s18, 512 }
  0xb8   : > { %501 = vmatpush1.bf16.msra.mxu0 %v2746_v5  ;;  %v322_v21 = vld [vmem:[#allocation2] sm:$0xf]  ;;  %542 = vmatpush1.bf16.msra.mxu1 %v2748_v13  ;;  %v2756_v22 = vcombine.low %v332_v10, %v336_v11  ;;  %v337_v24 = vld [vmem:[#allocation5 + $0x70] sm:$0xff]  ;;  %v2753_v25 = vcombine.high %v326_v18, %v330_v19  ;;  %v2752_v30 = vcombine.low %v326_v18, %v330_v19  ;;  %v3145_v36 = vld [vmem:[%s4026_s16] ss:$16 sps:$4 sm:$0xff]   ;;  %p3682_p3 = scmp.ne.s32.totalorder %s4369_s18, %s3681_s9  ;;  %p4460_p7 = scmp.ne.s32.totalorder %s4438_s30, 0 }
  0xb9   : > { %502 = vmatprep.subr.bf16.mxu0 %v2755_v8  ;;  %543 = vmatprep.subr.bf16.mxu1 %v2757_v14  ;;  %v334_v26 = vld [vmem:[#allocation5 + $0x58] sm:$0xff]  ;;  %v2759_v29 = vcombine.high %v333_v23, %v337_v24  ;;  %v2758_v32 = vcombine.low %v333_v23, %v337_v24  ;;  %v3150_v35 = vld [vmem:[%s4026_s16 + $0xc] ss:$16 sps:$4 sm:$0xff]   ;;  %v3148_v38 = vld [vmem:[%s4026_s16 + $0x8] ss:$16 sps:$4 sm:$0xff]   ;;  %s3767_s13 = smov [#allocation11]  }
  0xba   : > { %v338_v28 = vld [vmem:[#allocation5 + $0x78] sm:$0xff]  ;;  %v3156_v39 = vld [vmem:[%s4026_s16 + $0x2c] ss:$16 sps:$4 sm:$0xff]   ;;  %v3154_v42 = vld [vmem:[%s4026_s16 + $0x28] ss:$16 sps:$4 sm:$0xff]   ;;  %p3683_p9 = pnand %p3682_p3, %p4460_p7  ;;  %s3685_s27 = sshll.u32 %s3767_s13, 4  ;;  %s3686_s27 = int_to_ptr.vmem [resolvable:$false] %s3685_s27 }
  0xbb   : > { %v2761_v31 = vcombine.high %v334_v26, %v338_v28  ;;  %v3147_v33 = vld [vmem:[%s4026_s16 + $0x4] ss:$16 sps:$4 sm:$0xff]   ;;  %v2760_v34 = vcombine.low %v334_v26, %v338_v28  ;;  %v3151_v40 = vld [vmem:[%s4026_s16 + $0x20] ss:$16 sps:$4 sm:$0xff]   ;;  %v3162_v43 = vld [vmem:[%s4026_s16 + $0x4c] ss:$16 sps:$4 sm:$0xff]   ;;  %p3688_p13 = scmp.lt.s32.totalorder %s4369_s18, %s3686_s27 }
  0xbc   : > { %503 = vmatpush1.bf16.msra.mxu0 %v2754_v17  ;;  %544 = vmatpush1.bf16.msra.mxu1 %v2756_v22  ;;  %v3153_v37 = vld [vmem:[%s4026_s16 + $0x24] ss:$16 sps:$4 sm:$0xff]   ;;  %v3157_v44 = vld [vmem:[%s4026_s16 + $0x40] ss:$16 sps:$4 sm:$0xff]   ;;  %v3160_v46 = vld [vmem:[%s4026_s16 + $0x48] ss:$16 sps:$4 sm:$0xff]   ;;  %p3684_p8 = pneg %p3683_p9 }
  0xbd   : > { %582 = vmatprep.subr.bf16.mxu0 %v2751_v20  ;;  %623 = vmatprep.subr.bf16.mxu1 %v2753_v25  ;;  %v3159_v41 = vld [vmem:[%s4026_s16 + $0x44] ss:$16 sps:$4 sm:$0xff]   ;;  %v3168_v47 = vld [vmem:[%s4026_s16 + $0x6c] ss:$16 sps:$4 sm:$0xff]   ;;  %v3163_v48 = vld [vmem:[%s4026_s16 + $0x60] ss:$16 sps:$4 sm:$0xff]  }
  0xbe   : > { %v3165_v45 = vld [vmem:[%s4026_s16 + $0x64] ss:$16 sps:$4 sm:$0xff]   ;;  %v3166_v50 = vld [vmem:[%s4026_s16 + $0x68] ss:$16 sps:$4 sm:$0xff]   ;;  %v3174_v51 = vld [vmem:[%s4026_s16 + $0x8c] ss:$16 sps:$4 sm:$0xff]  }
  0xbf   : > { %2762 = vmatmul.mubr.msk.bf16.vlgmr.msra.gmra.mrb[0].mxu0 %vm496_vm0, %v322_v21  ;;  %2763 = vmatmul.mubr.msk.bf16.vlgmr.msra.gmra.mrb[0].mxu1 %vm496_vm0, %v322_v21  ;;  %v3171_v49 = vld [vmem:[%s4026_s16 + $0x84] ss:$16 sps:$4 sm:$0xff]   ;;  %v3169_v52 = vld [vmem:[%s4026_s16 + $0x80] ss:$16 sps:$4 sm:$0xff]   ;;  %v3172_v54 = vld [vmem:[%s4026_s16 + $0x88] ss:$16 sps:$4 sm:$0xff]  }
  0xc0   : > { %583 = vmatpush1.bf16.msra.mxu0 %v2750_v27  ;;  %614 = vmatprep.mubr.bf16.mxu0 %v3766_v0  ;;  %v3177_v53 = vld [vmem:[%s4026_s16 + $0xa4] ss:$16 sps:$4 sm:$0xff]   ;;  %v3180_v55 = vld [vmem:[%s4026_s16 + $0xac] ss:$16 sps:$4 sm:$0xff]   ;;  %v3175_v56 = vld [vmem:[%s4026_s16 + $0xa0] ss:$16 sps:$4 sm:$0xff]  }
  0xc1   : > { %584 = vmatprep.subr.bf16.mxu0 %v2759_v29  ;;  %624 = vmatpush1.bf16.msra.mxu1 %v2752_v30  ;;  %v3183_v57 = vld [vmem:[%s4026_s16 + $0xc4] ss:$16 sps:$4 sm:$0xff]   ;;  %v3178_v58 = vld [vmem:[%s4026_s16 + $0xa8] ss:$16 sps:$4 sm:$0xff]   ;;  %v3186_v59 = vld [vmem:[%s4026_s16 + $0xcc] ss:$16 sps:$4 sm:$0xff]  }
  0xc2   : > { %655 = vmatprep.mubr.bf16.mxu1 %v3766_v0  ;;  %625 = vmatprep.subr.bf16.mxu1 %v2761_v31  ;;  %v3181_v60 = vld [vmem:[%s4026_s16 + $0xc0] ss:$16 sps:$4 sm:$0xff]   ;;  %v3184_v61 = vld [vmem:[%s4026_s16 + $0xc8] ss:$16 sps:$4 sm:$0xff]   ;;  %v3189_v62 = vld [vmem:[%s4026_s16 + $0xe4] ss:$16 sps:$4 sm:$0xff]  }
  0xc3   : > { %v3187_v63 = vld [vmem:[%s4026_s16 + $0xe0] ss:$16 sps:$4 sm:$0xff]   ;;  %v3192_v0 = vld [vmem:[%s4026_s16 + $0xec] ss:$16 sps:$4 sm:$0xff]   ;;  %v3195_v1 = vld [vmem:[%s4026_s16 + $0x104] ss:$16 sps:$4 sm:$0xff]  }
  0xc4   : > { %585 = vmatpush1.bf16.msra.mxu0 %v2758_v32  ;;  %v3190_v2 = vld [vmem:[%s4026_s16 + $0xe8] ss:$16 sps:$4 sm:$0xff]   ;;  %v3198_v3 = vld [vmem:[%s4026_s16 + $0x10c] ss:$16 sps:$4 sm:$0xff]   ;;  %v3193_v4 = vld [vmem:[%s4026_s16 + $0x100] ss:$16 sps:$4 sm:$0xff]  }
  0xc5   : > { %2255 = vmatprep.subr.bf16.mxu0 %v3147_v33  ;;  %626 = vmatpush1.bf16.msra.mxu1 %v2760_v34  ;;  %v3201_v5 = vld [vmem:[%s4026_s16 + $0x124] ss:$16 sps:$4 sm:$0xff]   ;;  %v3196_v6 = vld [vmem:[%s4026_s16 + $0x108] ss:$16 sps:$4 sm:$0xff]   ;;  %v3204_v7 = vld [vmem:[%s4026_s16 + $0x12c] ss:$16 sps:$4 sm:$0xff]  }
  0xc6   : > { %2419 = vmatprep.subr.bf16.mxu1 %v3150_v35  ;;  %v3199_v8 = vld [vmem:[%s4026_s16 + $0x120] ss:$16 sps:$4 sm:$0xff]   ;;  %v3207_v9 = vld [vmem:[%s4026_s16 + $0x144] ss:$16 sps:$4 sm:$0xff]   ;;  %v3202_v10 = vld [vmem:[%s4026_s16 + $0x128] ss:$16 sps:$4 sm:$0xff]  }
  0xc7   : > { %2764 = vmatmul.mubr.msk.bf16.vlgmr.msra.gmra.mrb[4].mxu0 %vm496_vm0, %v322_v21  ;;  %v3210_v11 = vld [vmem:[%s4026_s16 + $0x14c] ss:$16 sps:$4 sm:$0xff]   ;;  %v3205_v12 = vld [vmem:[%s4026_s16 + $0x140] ss:$16 sps:$4 sm:$0xff]   ;;  %v3213_v13 = vld [vmem:[%s4026_s16 + $0x164] ss:$16 sps:$4 sm:$0xff]  }
  0xc8   : > { %2256 = vmatpush1.bf16.msra.mxu0 %v3145_v36  ;;  %2765 = vmatmul.mubr.msk.bf16.vlgmr.msra.gmra.mrb[4].mxu1 %vm496_vm0, %v322_v21  ;;  %v3208_v14 = vld [vmem:[%s4026_s16 + $0x148] ss:$16 sps:$4 sm:$0xff]   ;;  %v3216_v15 = vld [vmem:[%s4026_s16 + $0x16c] ss:$16 sps:$4 sm:$0xff]   ;;  %v3211_v16 = vld [vmem:[%s4026_s16 + $0x160] ss:$16 sps:$4 sm:$0xff]   ;;  %v344_v36 = vlaneseq }
  0xc9   : > { %2257 = vmatprep.subr.bf16.mxu0 %v3153_v37  ;;  %2420 = vmatpush1.bf16.msra.mxu1 %v3148_v38  ;;  %v3219_v17 = vld [vmem:[%s4026_s16 + $0x184] ss:$16 sps:$4 sm:$0xff]   ;;  %v3214_v18 = vld [vmem:[%s4026_s16 + $0x168] ss:$16 sps:$4 sm:$0xff]   ;;  %v3222_v19 = vld [vmem:[%s4026_s16 + $0x18c] ss:$16 sps:$4 sm:$0xff]  }
  0xca   : > { %2421 = vmatprep.subr.bf16.mxu1 %v3156_v39  ;;  %v3217_v20 = vld [vmem:[%s4026_s16 + $0x180] ss:$16 sps:$4 sm:$0xff]   ;;  %v3225_v21 = vld [vmem:[%s4026_s16 + $0x1a4] ss:$16 sps:$4 sm:$0xff]   ;;  %v3220_v22 = vld [vmem:[%s4026_s16 + $0x188] ss:$16 sps:$4 sm:$0xff]  }
  0xcb   : > { %v3228_v23 = vld [vmem:[%s4026_s16 + $0x1ac] ss:$16 sps:$4 sm:$0xff]   ;;  %v3223_v24 = vld [vmem:[%s4026_s16 + $0x1a0] ss:$16 sps:$4 sm:$0xff]   ;;  %v3226_v25 = vld [vmem:[%s4026_s16 + $0x1a8] ss:$16 sps:$4 sm:$0xff]  }
  0xcc   : > { %2258 = vmatpush1.bf16.msra.mxu0 %v3151_v40  ;;  %v3231_v26 = vld [vmem:[%s4026_s16 + $0x1c4] ss:$16 sps:$4 sm:$0xff]   ;;  %v3234_v27 = vld [vmem:[%s4026_s16 + $0x1cc] ss:$16 sps:$4 sm:$0xff]   ;;  %v3229_v28 = vld [vmem:[%s4026_s16 + $0x1c0] ss:$16 sps:$4 sm:$0xff]  }
  0xcd   : > { %2259 = vmatprep.subr.bf16.mxu0 %v3159_v41  ;;  %2422 = vmatpush1.bf16.msra.mxu1 %v3154_v42  ;;  %v3232_v29 = vld [vmem:[%s4026_s16 + $0x1c8] ss:$16 sps:$4 sm:$0xff]   ;;  %v3237_v30 = vld [vmem:[%s4026_s16 + $0x1e4] ss:$16 sps:$4 sm:$0xff]   ;;  %v3240_v31 = vld [vmem:[%s4026_s16 + $0x1ec] ss:$16 sps:$4 sm:$0xff]  }
  0xce   : > { %2423 = vmatprep.subr.bf16.mxu1 %v3162_v43  ;;  %v3235_v32 = vld [vmem:[%s4026_s16 + $0x1e0] ss:$16 sps:$4 sm:$0xff]   ;;  %v3238_v33 = vld [vmem:[%s4026_s16 + $0x1e8] ss:$16 sps:$4 sm:$0xff]   ;;  %v3243_v34 = vld [vmem:[%s4026_s16 + $0x204] ss:$16 sps:$4 sm:$0xff]  }
  0xcf   : > { %v3246_v35 = vld [vmem:[%s4026_s16 + $0x20c] ss:$16 sps:$4 sm:$0xff]   ;;  %v4102_v37 = vshrl.u32 %v344_v36, 7  ;;  %s3687_s14 = scalar_lea.vmem %s3686_s27, 1024 }
  0xd0   : > { %2260 = vmatpush1.bf16.msra.mxu0 %v3157_v44  ;;  %v4104_v38 = vld [vmem:[#allocation7] sm:$0xff]  ;;  %p3689_p11 = scmp.lt.s32.totalorder %s3687_s14, %s3681_s9 }
  0xd1   : > { %2261 = vmatprep.subr.bf16.mxu0 %v3165_v45  ;;  %2424 = vmatpush1.bf16.msra.mxu1 %v3160_v46  ;;  %v4107_v39 = vunpack.c.l.bf16 %v4104_v38  ;;  %v4110_v40 = vsub.s32 0, %v4102_v37  ;;  %v4113_v41 = vsub.s32 2, %v4102_v37  ;;  %v4116_v42 = vsub.s32 6, %v4102_v37  ;;  %v3282_v36 = vld [vmem:[%s4026_s16 + $0x2cc] ss:$16 sps:$4 sm:$0xff]  }
  0xd2   : > { %2425 = vmatprep.subr.bf16.mxu1 %v3168_v47  ;;  %p3690_p1 = por %p3689_p11, %p3688_p13 }
  0xd3   : > { %v347_v43 = vrot.slane %v4107_v39, %v4110_v40  ;;  %v351_v44 = vrot.slane %v4107_v39, %v4113_v41  ;;  %v359_v45 = vrot.slane %v4107_v39, %v4116_v42 }
  0xd4   : > { %2262 = vmatpush1.bf16.msra.mxu0 %v3163_v48  ;;  %p3691_p2 = pnand %p3690_p1, %p3684_p8 }
  0xd5   : > { %2263 = vmatprep.subr.bf16.mxu0 %v3171_v49  ;;  %2426 = vmatpush1.bf16.msra.mxu1 %v3166_v50  ;;  %v387_v46 = vrot.slane %v347_v43, %v4110_v40  ;;  %v391_v47 = vrot.slane %v351_v44, %v4110_v40  ;;  %v399_v49 = vrot.slane %v359_v45, %v4110_v40  ;;  %v3277_v45 = vld [vmem:[%s4026_s16 + $0x2c0] ss:$16 sps:$4 sm:$0xff]  }
  0xd6   : > { %2427 = vmatprep.subr.bf16.mxu1 %v3174_v51 }
  0xd8   : > { %2264 = vmatpush1.bf16.msra.mxu0 %v3169_v52 }
  0xd9   : > { %2265 = vmatprep.subr.bf16.mxu0 %v3177_v53  ;;  %2428 = vmatpush1.bf16.msra.mxu1 %v3172_v54 }
  0xda   : > { %2429 = vmatprep.subr.bf16.mxu1 %v3180_v55 }
  0xdc   : > { %2266 = vmatpush1.bf16.msra.mxu0 %v3175_v56 }
  0xdd   : > { %2267 = vmatprep.subr.bf16.mxu0 %v3183_v57  ;;  %2430 = vmatpush1.bf16.msra.mxu1 %v3178_v58 }
  0xde   : > { %2431 = vmatprep.subr.bf16.mxu1 %v3186_v59 }
  0xe0   : > { %2268 = vmatpush1.bf16.msra.mxu0 %v3181_v60 }
  0xe1   : > { %2269 = vmatprep.subr.bf16.mxu0 %v3189_v62  ;;  %2432 = vmatpush1.bf16.msra.mxu1 %v3184_v61 }
  0xe2   : > { %2433 = vmatprep.subr.bf16.mxu1 %v3192_v0  ;;  %v3244_v0 = vld [vmem:[%s4026_s16 + $0x208] ss:$16 sps:$4 sm:$0xff]  }
  0xe4   : > { %2270 = vmatpush1.bf16.msra.mxu0 %v3187_v63  ;;  %v3241_v63 = vld [vmem:[%s4026_s16 + $0x200] ss:$16 sps:$4 sm:$0xff]  }
  0xe5   : > { %2271 = vmatprep.subr.bf16.mxu0 %v3195_v1  ;;  %2434 = vmatpush1.bf16.msra.mxu1 %v3190_v2 }
  0xe6   : > { %2435 = vmatprep.subr.bf16.mxu1 %v3198_v3  ;;  %v3249_v3 = vld [vmem:[%s4026_s16 + $0x224] ss:$16 sps:$4 sm:$0xff]  }
  0xe8   : > { %2272 = vmatpush1.bf16.msra.mxu0 %v3193_v4  ;;  %v3252_v4 = vld [vmem:[%s4026_s16 + $0x22c] ss:$16 sps:$4 sm:$0xff]  }
  0xe9   : > { %2273 = vmatprep.subr.bf16.mxu0 %v3201_v5  ;;  %2436 = vmatpush1.bf16.msra.mxu1 %v3196_v6 }
  0xea   : > { %2437 = vmatprep.subr.bf16.mxu1 %v3204_v7 }
  0xec   : > { %2274 = vmatpush1.bf16.msra.mxu0 %v3199_v8  ;;  %v3247_v8 = vld [vmem:[%s4026_s16 + $0x220] ss:$16 sps:$4 sm:$0xff]  }
  0xed   : > { %2275 = vmatprep.subr.bf16.mxu0 %v3207_v9  ;;  %2438 = vmatpush1.bf16.msra.mxu1 %v3202_v10  ;;  %v3250_v9 = vld [vmem:[%s4026_s16 + $0x228] ss:$16 sps:$4 sm:$0xff]  }
  0xee   : > { %2439 = vmatprep.subr.bf16.mxu1 %v3210_v11  ;;  %v3255_v11 = vld [vmem:[%s4026_s16 + $0x244] ss:$16 sps:$4 sm:$0xff]  }
  0xf0   : > { %2276 = vmatpush1.bf16.msra.mxu0 %v3205_v12  ;;  %v3258_v12 = vld [vmem:[%s4026_s16 + $0x24c] ss:$16 sps:$4 sm:$0xff]  }
  0xf1   : > { %2277 = vmatprep.subr.bf16.mxu0 %v3213_v13  ;;  %2440 = vmatpush1.bf16.msra.mxu1 %v3208_v14  ;;  %v3253_v14 = vld [vmem:[%s4026_s16 + $0x240] ss:$16 sps:$4 sm:$0xff]  }
  0xf2   : > { %2441 = vmatprep.subr.bf16.mxu1 %v3216_v15  ;;  %v3256_v15 = vld [vmem:[%s4026_s16 + $0x248] ss:$16 sps:$4 sm:$0xff]  }
  0xf4   : > { %2278 = vmatpush1.bf16.msra.mxu0 %v3211_v16  ;;  %v3261_v16 = vld [vmem:[%s4026_s16 + $0x264] ss:$16 sps:$4 sm:$0xff]  }
  0xf5   : > { %2279 = vmatprep.subr.bf16.mxu0 %v3219_v17  ;;  %2442 = vmatpush1.bf16.msra.mxu1 %v3214_v18  ;;  %v3264_v17 = vld [vmem:[%s4026_s16 + $0x26c] ss:$16 sps:$4 sm:$0xff]   ;;  %v3259_v18 = vld [vmem:[%s4026_s16 + $0x260] ss:$16 sps:$4 sm:$0xff]  }
  0xf6   : > { %2443 = vmatprep.subr.bf16.mxu1 %v3222_v19  ;;  %v3262_v19 = vld [vmem:[%s4026_s16 + $0x268] ss:$16 sps:$4 sm:$0xff]  }
  0xf8   : > { %2280 = vmatpush1.bf16.msra.mxu0 %v3217_v20  ;;  %v3267_v20 = vld [vmem:[%s4026_s16 + $0x284] ss:$16 sps:$4 sm:$0xff]  }
  0xf9   : > { %2281 = vmatprep.subr.bf16.mxu0 %v3225_v21  ;;  %2444 = vmatpush1.bf16.msra.mxu1 %v3220_v22  ;;  %v3270_v21 = vld [vmem:[%s4026_s16 + $0x28c] ss:$16 sps:$4 sm:$0xff]   ;;  %v4150_v22 = vsub.s32 4, %v4102_v37 }
  0xfa   : > { %2445 = vmatprep.subr.bf16.mxu1 %v3228_v23  ;;  %v4153_v23 = vunpack.c.h.bf16 %v4104_v38 }
  0xfc   : > { %2282 = vmatpush1.bf16.msra.mxu0 %v3223_v24  ;;  %v3265_v24 = vld [vmem:[%s4026_s16 + $0x280] ss:$16 sps:$4 sm:$0xff]  }
  0xfd   : > { %2446 = vmatpush1.bf16.msra.mxu1 %v3226_v25  ;;  %2283 = vmatprep.subr.bf16.mxu0 %v3231_v26  ;;  %v3268_v25 = vld [vmem:[%s4026_s16 + $0x288] ss:$16 sps:$4 sm:$0xff]   ;;  %v3273_v26 = vld [vmem:[%s4026_s16 + $0x2a4] ss:$16 sps:$4 sm:$0xff]  }
  0xfe   : > { %2447 = vmatprep.subr.bf16.mxu1 %v3234_v27  ;;  %v3276_v27 = vld [vmem:[%s4026_s16 + $0x2ac] ss:$16 sps:$4 sm:$0xff]  }
 0x100   : > { %2284 = vmatpush1.bf16.msra.mxu0 %v3229_v28  ;;  %v371_v28 = vrot.slane %v4153_v23, %v4150_v22 }
 0x101   : > { %2448 = vmatpush1.bf16.msra.mxu1 %v3232_v29  ;;  %2285 = vmatprep.subr.bf16.mxu0 %v3237_v30 }
 0x102   : > { %2449 = vmatprep.subr.bf16.mxu1 %v3240_v31  ;;  %v411_v30 = vrot.slane %v371_v28, %v4110_v40  ;;  %v3271_v31 = vld [vmem:[%s4026_s16 + $0x2a0] ss:$16 sps:$4 sm:$0xff]  }
 0x104   : > { %2286 = vmatpush1.bf16.msra.mxu0 %v3235_v32  ;;  %v3274_v32 = vld [vmem:[%s4026_s16 + $0x2a8] ss:$16 sps:$4 sm:$0xff]  }
 0x105   : > { %2450 = vmatpush1.bf16.msra.mxu1 %v3238_v33  ;;  %2296 = vmatprep.subr.bf16.mxu0 %v3243_v34  ;;  %v375_v33 = vrot.slane %v4153_v23, %v4116_v42 }
 0x106   : > { %2460 = vmatprep.subr.bf16.mxu1 %v3246_v35  ;;  %v3279_v35 = vld [vmem:[%s4026_s16 + $0x2c4] ss:$16 sps:$4 sm:$0xff]  }
 0x107   : > { %v415_v43 = vrot.slane %v375_v33, %v4110_v40 }
 0x192   : > { %v534_v48 = vpop.f32.mrb[0].mxu0  ;;  %v4127_v54 = vpop.f32.mrb[0].mxu1 }
 0x193   : > { %v535_v50 = vadd.f32 %v534_v48, %v387_v46  ;;  %v536_v51 = vpop.f32.mrb[1].mxu0  ;;  %v577_v57 = vpop.f32.mrb[1].mxu1  ;;  %v3280_v46 = vld [vmem:[%s4026_s16 + $0x2c8] ss:$16 sps:$4 sm:$0xff]   ;;  %v3285_v48 = vld [vmem:[%s4026_s16 + $0x2e4] ss:$16 sps:$4 sm:$0xff]  }
 0x194   : > { %v537_v52 = vadd.f32 %v536_v51, %v391_v47  ;;  %v538_v53 = vpop.f32.mrb[2].mxu0  ;;  %v578_v59 = vadd.f32 %v577_v57, %v399_v49  ;;  %v579_v60 = vpop.f32.mrb[2].mxu1  ;;  %v3288_v49 = vld [vmem:[%s4026_s16 + $0x2ec] ss:$16 sps:$4 sm:$0xff]   ;;  %v3286_v51 = vld [vmem:[%s4026_s16 + $0x2e8] ss:$16 sps:$4 sm:$0xff]  }
 0x195   : > { %v664_v55 = vmax.f32 %v535_v50, 0.0  ;;  %v539_v56 = vpop.f32.mrb[3].mxu0  ;;  %v580_v61 = vpop.f32.mrb[3].mxu1  ;;  %v3283_v50 = vld [vmem:[%s4026_s16 + $0x2e0] ss:$16 sps:$4 sm:$0xff]  }
 0x196   : > { %v665_v58 = vmax.f32 %v537_v52, 0.0  ;;  %v667_v1 = vmax.f32 %v578_v59, 0.0  ;;  %v3291_v52 = vld [vmem:[%s4026_s16 + $0x304] ss:$16 sps:$4 sm:$0xff]   ;;  %v3294_v53 = vld [vmem:[%s4026_s16 + $0x30c] ss:$16 sps:$4 sm:$0xff]  }
 0x197   : > { %v672_v2 = vpack.c.bf16 %v664_v55, %v664_v55  ;;  %v3289_v55 = vld [vmem:[%s4026_s16 + $0x300] ss:$16 sps:$4 sm:$0xff]   ;;  %v3292_v56 = vld [vmem:[%s4026_s16 + $0x308] ss:$16 sps:$4 sm:$0xff]   ;;  %v3297_v57 = vld [vmem:[%s4026_s16 + $0x324] ss:$16 sps:$4 sm:$0xff]  }
 0x198   : > { %v673_v62 = vpack.c.bf16 %v665_v58, %v665_v58  ;;  %v675_v5 = vpack.c.bf16 %v667_v1, %v667_v1  ;;  %v3300_v58 = vld [vmem:[%s4026_s16 + $0x32c] ss:$16 sps:$4 sm:$0xff]   ;;  %v3295_v59 = vld [vmem:[%s4026_s16 + $0x320] ss:$16 sps:$4 sm:$0xff]   ;;  %v3298_v60 = vld [vmem:[%s4026_s16 + $0x328] ss:$16 sps:$4 sm:$0xff]  }
 0x199   : > { %v3303_v61 = vld [vmem:[%s4026_s16 + $0x344] ss:$16 sps:$4 sm:$0xff]  }
 0x19a   : > { %2287 = vmatprep.mubr.bf16.mxu0 %v673_v62  ;;  %2451 = vmatprep.mubr.bf16.mxu1 %v673_v62  ;;  %v4133_v6 = vpop.f32.mrb[4].mxu0  ;;  %v3306_v62 = vld [vmem:[%s4026_s16 + $0x34c] ss:$16 sps:$4 sm:$0xff]   ;;  %v3309_v1 = vld [vmem:[%s4026_s16 + $0x364] ss:$16 sps:$4 sm:$0xff]  }
 0x19b   : > { %2288 = vmatmul.mubr.bf16.vlgmr.msra.gmra.mrb[8].mxu0 %v672_v2  ;;  %2452 = vmatmul.mubr.bf16.vlgmr.msra.gmra.mrb[8].mxu1 %v672_v2  ;;  %v4135_v7 = vpop.f32.mrb[5].mxu0  ;;  %v657_v29 = vpop.f32.mrb[4].mxu1  ;;  %v3312_v2 = vld [vmem:[%s4026_s16 + $0x36c] ss:$16 sps:$4 sm:$0xff]  }
 0x19c   : > { %2297 = vmatpush1.bf16.msra.mxu0 %v3241_v63  ;;  %2461 = vmatpush1.bf16.msra.mxu1 %v3244_v0  ;;  %v620_v10 = vpop.f32.mrb[6].mxu0  ;;  %v659_v34 = vpop.f32.mrb[5].mxu1  ;;  %v4168_v37 = vadd.f32 %v657_v29, %v411_v30  ;;  %v3301_v63 = vld [vmem:[%s4026_s16 + $0x340] ss:$16 sps:$4 sm:$0xff]   ;;  %v3304_v0 = vld [vmem:[%s4026_s16 + $0x348] ss:$16 sps:$4 sm:$0xff]  }
 0x19d   : > { %2298 = vmatprep.subr.bf16.mxu0 %v3249_v3  ;;  %2462 = vmatprep.subr.bf16.mxu1 %v3252_v4  ;;  %v621_v13 = vpop.f32.mrb[7].mxu0  ;;  %v661_v38 = vpop.f32.mrb[6].mxu1  ;;  %v4173_v47 = vadd.f32 %v659_v34, %v415_v43  ;;  %v3307_v3 = vld [vmem:[%s4026_s16 + $0x360] ss:$16 sps:$4 sm:$0xff]   ;;  %v3310_v4 = vld [vmem:[%s4026_s16 + $0x368] ss:$16 sps:$4 sm:$0xff]  }
 0x19e   : > { %2328 = vmatprep.mubr.bf16.mxu0 %v675_v5  ;;  %2492 = vmatprep.mubr.bf16.mxu1 %v675_v5  ;;  %v662_v44 = vpop.f32.mrb[7].mxu1  ;;  %v3315_v5 = vld [vmem:[%s4026_s16 + $0x384] ss:$16 sps:$4 sm:$0xff]   ;;  %v3313_v10 = vld [vmem:[%s4026_s16 + $0x380] ss:$16 sps:$4 sm:$0xff]  }
 0x19f   : > { %v3324_v13 = vld [vmem:[%s4026_s16 + $0x3ac] ss:$16 sps:$4 sm:$0xff]   ;;  %v3334_v29 = vld [vmem:[%s4026_s16 + $0x3e8] ss:$16 sps:$4 sm:$0xff]   ;;  %v3339_v30 = vld [vmem:[%s4026_s16 + $0x404] ss:$16 sps:$4 sm:$0xff]  }
 0x1a0   : > { %2299 = vmatpush1.bf16.msra.mxu0 %v3247_v8  ;;  %2463 = vmatpush1.bf16.msra.mxu1 %v3250_v9  ;;  %v3318_v8 = vld [vmem:[%s4026_s16 + $0x38c] ss:$16 sps:$4 sm:$0xff]   ;;  %v355_v9 = vrot.slane %v4107_v39, %v4150_v22  ;;  %v3319_v39 = vld [vmem:[%s4026_s16 + $0x3a0] ss:$16 sps:$4 sm:$0xff]   ;;  %v3346_v44 = vld [vmem:[%s4026_s16 + $0x428] ss:$16 sps:$4 sm:$0xff]  }
 0x1a1   : > { %2300 = vmatprep.subr.bf16.mxu0 %v3255_v11  ;;  %2464 = vmatprep.subr.bf16.mxu1 %v3258_v12  ;;  %v3316_v11 = vld [vmem:[%s4026_s16 + $0x388] ss:$16 sps:$4 sm:$0xff]   ;;  %v3321_v12 = vld [vmem:[%s4026_s16 + $0x3a4] ss:$16 sps:$4 sm:$0xff]   ;;  %v3337_v34 = vld [vmem:[%s4026_s16 + $0x400] ss:$16 sps:$4 sm:$0xff]  }
 0x1a2   : > { %v3343_v43 = vld [vmem:[%s4026_s16 + $0x420] ss:$16 sps:$4 sm:$0xff]  }
 0x1a4   : > { %2301 = vmatpush1.bf16.msra.mxu0 %v3253_v14  ;;  %2465 = vmatpush1.bf16.msra.mxu1 %v3256_v15  ;;  %v367_v14 = vrot.slane %v4153_v23, %v4113_v41  ;;  %v395_v15 = vrot.slane %v355_v9, %v4110_v40  ;;  %v3387_v9 = vld [vmem:[%s4026_s16 + $0x504] ss:$16 sps:$4 sm:$0xff]  }
 0x1a5   : > { %2302 = vmatprep.subr.bf16.mxu0 %v3261_v16  ;;  %2466 = vmatprep.subr.bf16.mxu1 %v3264_v17  ;;  %v3322_v16 = vld [vmem:[%s4026_s16 + $0x3a8] ss:$16 sps:$4 sm:$0xff]   ;;  %v3327_v17 = vld [vmem:[%s4026_s16 + $0x3c4] ss:$16 sps:$4 sm:$0xff]  }
 0x1a8   : > { %2303 = vmatpush1.bf16.msra.mxu0 %v3259_v18  ;;  %2467 = vmatpush1.bf16.msra.mxu1 %v3262_v19  ;;  %v3330_v18 = vld [vmem:[%s4026_s16 + $0x3cc] ss:$16 sps:$4 sm:$0xff]   ;;  %v407_v19 = vrot.slane %v367_v14, %v4110_v40 }
 0x1a9   : > { %2304 = vmatprep.subr.bf16.mxu0 %v3267_v20  ;;  %2468 = vmatprep.subr.bf16.mxu1 %v3270_v21  ;;  %v576_v20 = vadd.f32 %v4127_v54, %v395_v15  ;;  %v3325_v21 = vld [vmem:[%s4026_s16 + $0x3c0] ss:$16 sps:$4 sm:$0xff]   ;;  %v3396_v14 = vld [vmem:[%s4026_s16 + $0x52c] ss:$16 sps:$4 sm:$0xff]  }
 0x1aa   : > { %v3331_v54 = vld [vmem:[%s4026_s16 + $0x3e0] ss:$16 sps:$4 sm:$0xff]  }
 0x1ab   : > { %v666_v28 = vmax.f32 %v576_v20, 0.0  ;;  %v3391_v15 = vld [vmem:[%s4026_s16 + $0x520] ss:$16 sps:$4 sm:$0xff]   ;;  %v3405_v20 = vld [vmem:[%s4026_s16 + $0x564] ss:$16 sps:$4 sm:$0xff]  }
 0x1ac   : > { %2305 = vmatpush1.bf16.msra.mxu0 %v3265_v24  ;;  %2469 = vmatpush1.bf16.msra.mxu1 %v3268_v25  ;;  %v3328_v24 = vld [vmem:[%s4026_s16 + $0x3c8] ss:$16 sps:$4 sm:$0xff]   ;;  %v3333_v25 = vld [vmem:[%s4026_s16 + $0x3e4] ss:$16 sps:$4 sm:$0xff]  }
 0x1ad   : > { %2306 = vmatprep.subr.bf16.mxu0 %v3273_v26  ;;  %2470 = vmatprep.subr.bf16.mxu1 %v3276_v27  ;;  %v3336_v26 = vld [vmem:[%s4026_s16 + $0x3ec] ss:$16 sps:$4 sm:$0xff]   ;;  %v619_v27 = vadd.f32 %v4135_v7, %v407_v19  ;;  %v674_v33 = vpack.c.bf16 %v666_v28, %v666_v28  ;;  %v3340_v7 = vld [vmem:[%s4026_s16 + $0x408] ss:$16 sps:$4 sm:$0xff]   ;;  %v363_v28 = vrot.slane %v4153_v23, %v4110_v40 }
 0x1ae   : > { %v3400_v19 = vld [vmem:[%s4026_s16 + $0x548] ss:$16 sps:$4 sm:$0xff]  }
 0x1af   : > { %v3418_v23 = vld [vmem:[%s4026_s16 + $0x5a8] ss:$16 sps:$4 sm:$0xff]  }
 0x1b0   : > { %2307 = vmatpush1.bf16.msra.mxu0 %v3271_v31  ;;  %2471 = vmatpush1.bf16.msra.mxu1 %v3274_v32  ;;  %v3342_v31 = vld [vmem:[%s4026_s16 + $0x40c] ss:$16 sps:$4 sm:$0xff]   ;;  %v669_v32 = vmax.f32 %v619_v27, 0.0 }
 0x1b1   : > { %2308 = vmatprep.subr.bf16.mxu0 %v3279_v35  ;;  %2472 = vmatprep.subr.bf16.mxu1 %v3282_v36  ;;  %v3345_v35 = vld [vmem:[%s4026_s16 + $0x424] ss:$16 sps:$4 sm:$0xff]   ;;  %v3348_v36 = vld [vmem:[%s4026_s16 + $0x42c] ss:$16 sps:$4 sm:$0xff]  }
 0x1b2   : > { %v677_v38 = vpack.c.bf16 %v669_v32, %v669_v32  ;;  %v3414_v27 = vld [vmem:[%s4026_s16 + $0x58c] ss:$16 sps:$4 sm:$0xff]   ;;  %v403_v32 = vrot.slane %v363_v28, %v4110_v40  ;;  %v3487_v28 = vld [vmem:[%s4026_s16 + $0x720] ss:$16 sps:$4 sm:$0xff]  }
 0x1b4   : > { %2309 = vmatpush1.bf16.msra.mxu0 %v3277_v45  ;;  %2473 = vmatpush1.bf16.msra.mxu1 %v3280_v46  ;;  %v3351_v45 = vld [vmem:[%s4026_s16 + $0x444] ss:$16 sps:$4 sm:$0xff]   ;;  %v3354_v46 = vld [vmem:[%s4026_s16 + $0x44c] ss:$16 sps:$4 sm:$0xff]  }
 0x1b5   : > { %2310 = vmatprep.subr.bf16.mxu0 %v3285_v48  ;;  %2474 = vmatprep.subr.bf16.mxu1 %v3288_v49  ;;  %v3349_v48 = vld [vmem:[%s4026_s16 + $0x440] ss:$16 sps:$4 sm:$0xff]   ;;  %v3352_v49 = vld [vmem:[%s4026_s16 + $0x448] ss:$16 sps:$4 sm:$0xff]  }
 0x1b8   : > { %2311 = vmatpush1.bf16.msra.mxu0 %v3283_v50  ;;  %2475 = vmatpush1.bf16.msra.mxu1 %v3286_v51  ;;  %v3357_v50 = vld [vmem:[%s4026_s16 + $0x464] ss:$16 sps:$4 sm:$0xff]   ;;  %v3360_v51 = vld [vmem:[%s4026_s16 + $0x46c] ss:$16 sps:$4 sm:$0xff]  }
 0x1b9   : > { %2312 = vmatprep.subr.bf16.mxu0 %v3291_v52  ;;  %2476 = vmatprep.subr.bf16.mxu1 %v3294_v53  ;;  %v3355_v52 = vld [vmem:[%s4026_s16 + $0x460] ss:$16 sps:$4 sm:$0xff]   ;;  %v3358_v53 = vld [vmem:[%s4026_s16 + $0x468] ss:$16 sps:$4 sm:$0xff]  }
 0x1bc   : > { %2313 = vmatpush1.bf16.msra.mxu0 %v3289_v55  ;;  %2477 = vmatpush1.bf16.msra.mxu1 %v3292_v56  ;;  %v3363_v55 = vld [vmem:[%s4026_s16 + $0x484] ss:$16 sps:$4 sm:$0xff]   ;;  %v3366_v56 = vld [vmem:[%s4026_s16 + $0x48c] ss:$16 sps:$4 sm:$0xff]  }
 0x1bd   : > { %2314 = vmatprep.subr.bf16.mxu0 %v3297_v57  ;;  %2478 = vmatprep.subr.bf16.mxu1 %v3300_v58  ;;  %v3361_v57 = vld [vmem:[%s4026_s16 + $0x480] ss:$16 sps:$4 sm:$0xff]   ;;  %v3364_v58 = vld [vmem:[%s4026_s16 + $0x488] ss:$16 sps:$4 sm:$0xff]  }
 0x1c0   : > { %2315 = vmatpush1.bf16.msra.mxu0 %v3295_v59  ;;  %2479 = vmatpush1.bf16.msra.mxu1 %v3298_v60  ;;  %v3369_v59 = vld [vmem:[%s4026_s16 + $0x4a4] ss:$16 sps:$4 sm:$0xff]   ;;  %v3372_v60 = vld [vmem:[%s4026_s16 + $0x4ac] ss:$16 sps:$4 sm:$0xff]  }
 0x1c1   : > { %2316 = vmatprep.subr.bf16.mxu0 %v3303_v61  ;;  %2480 = vmatprep.subr.bf16.mxu1 %v3306_v62  ;;  %v3367_v61 = vld [vmem:[%s4026_s16 + $0x4a0] ss:$16 sps:$4 sm:$0xff]   ;;  %v3370_v62 = vld [vmem:[%s4026_s16 + $0x4a8] ss:$16 sps:$4 sm:$0xff]  }
 0x1c4   : > { %2317 = vmatpush1.bf16.msra.mxu0 %v3301_v63  ;;  %2481 = vmatpush1.bf16.msra.mxu1 %v3304_v0  ;;  %v3375_v63 = vld [vmem:[%s4026_s16 + $0x4c4] ss:$16 sps:$4 sm:$0xff]   ;;  %v3378_v0 = vld [vmem:[%s4026_s16 + $0x4cc] ss:$16 sps:$4 sm:$0xff]  }
 0x1c5   : > { %2318 = vmatprep.subr.bf16.mxu0 %v3309_v1  ;;  %2482 = vmatprep.subr.bf16.mxu1 %v3312_v2  ;;  %v3373_v1 = vld [vmem:[%s4026_s16 + $0x4c0] ss:$16 sps:$4 sm:$0xff]   ;;  %v3376_v2 = vld [vmem:[%s4026_s16 + $0x4c8] ss:$16 sps:$4 sm:$0xff]  }
 0x1c8   : > { %2319 = vmatpush1.bf16.msra.mxu0 %v3307_v3  ;;  %2483 = vmatpush1.bf16.msra.mxu1 %v3310_v4  ;;  %v3381_v3 = vld [vmem:[%s4026_s16 + $0x4e4] ss:$16 sps:$4 sm:$0xff]   ;;  %v3384_v4 = vld [vmem:[%s4026_s16 + $0x4ec] ss:$16 sps:$4 sm:$0xff]  }
 0x1c9   : > { %2320 = vmatprep.subr.bf16.mxu0 %v3315_v5  ;;  %2484 = vmatprep.subr.bf16.mxu1 %v3318_v8  ;;  %v3379_v5 = vld [vmem:[%s4026_s16 + $0x4e0] ss:$16 sps:$4 sm:$0xff]   ;;  %v3382_v8 = vld [vmem:[%s4026_s16 + $0x4e8] ss:$16 sps:$4 sm:$0xff]  }
 0x1cc   : > { %2321 = vmatpush1.bf16.msra.mxu0 %v3313_v10  ;;  %2485 = vmatpush1.bf16.msra.mxu1 %v3316_v11  ;;  %v3390_v10 = vld [vmem:[%s4026_s16 + $0x50c] ss:$16 sps:$4 sm:$0xff]   ;;  %v3385_v11 = vld [vmem:[%s4026_s16 + $0x500] ss:$16 sps:$4 sm:$0xff]  }
 0x1cd   : > { %2322 = vmatprep.subr.bf16.mxu0 %v3321_v12  ;;  %2486 = vmatprep.subr.bf16.mxu1 %v3324_v13  ;;  %v3388_v12 = vld [vmem:[%s4026_s16 + $0x508] ss:$16 sps:$4 sm:$0xff]   ;;  %v3393_v13 = vld [vmem:[%s4026_s16 + $0x524] ss:$16 sps:$4 sm:$0xff]  }
 0x1d0   : > { %2323 = vmatpush1.bf16.msra.mxu0 %v3319_v39  ;;  %2487 = vmatpush1.bf16.msra.mxu1 %v3322_v16  ;;  %v3394_v39 = vld [vmem:[%s4026_s16 + $0x528] ss:$16 sps:$4 sm:$0xff]   ;;  %v3399_v16 = vld [vmem:[%s4026_s16 + $0x544] ss:$16 sps:$4 sm:$0xff]  }
 0x1d1   : > { %2324 = vmatprep.subr.bf16.mxu0 %v3327_v17  ;;  %2488 = vmatprep.subr.bf16.mxu1 %v3330_v18  ;;  %v3402_v17 = vld [vmem:[%s4026_s16 + $0x54c] ss:$16 sps:$4 sm:$0xff]   ;;  %v3397_v18 = vld [vmem:[%s4026_s16 + $0x540] ss:$16 sps:$4 sm:$0xff]  }
 0x1d4   : > { %2325 = vmatpush1.bf16.msra.mxu0 %v3325_v21  ;;  %2489 = vmatpush1.bf16.msra.mxu1 %v3328_v24  ;;  %v3408_v21 = vld [vmem:[%s4026_s16 + $0x56c] ss:$16 sps:$4 sm:$0xff]   ;;  %v3403_v24 = vld [vmem:[%s4026_s16 + $0x560] ss:$16 sps:$4 sm:$0xff]  }
 0x1d5   : > { %2326 = vmatprep.subr.bf16.mxu0 %v3333_v25  ;;  %2490 = vmatprep.subr.bf16.mxu1 %v3336_v26  ;;  %v3406_v25 = vld [vmem:[%s4026_s16 + $0x568] ss:$16 sps:$4 sm:$0xff]   ;;  %v3411_v26 = vld [vmem:[%s4026_s16 + $0x584] ss:$16 sps:$4 sm:$0xff]  }
 0x1d8   : > { %2327 = vmatpush1.bf16.msra.mxu0 %v3331_v54  ;;  %2491 = vmatpush1.bf16.msra.mxu1 %v3334_v29  ;;  %v3409_v54 = vld [vmem:[%s4026_s16 + $0x580] ss:$16 sps:$4 sm:$0xff]   ;;  %v3412_v29 = vld [vmem:[%s4026_s16 + $0x588] ss:$16 sps:$4 sm:$0xff]  }
 0x1d9   : > { %2337 = vmatprep.subr.bf16.mxu0 %v3339_v30  ;;  %2501 = vmatprep.subr.bf16.mxu1 %v3342_v31  ;;  %v3417_v30 = vld [vmem:[%s4026_s16 + $0x5a4] ss:$16 sps:$4 sm:$0xff]   ;;  %v3420_v31 = vld [vmem:[%s4026_s16 + $0x5ac] ss:$16 sps:$4 sm:$0xff]  }
 0x1db   : > { %2329 = vmatmul.mubr.bf16.vlgmr.msra.gmra.mrb[8].mxu0 %v674_v33  ;;  %2493 = vmatmul.mubr.bf16.vlgmr.msra.gmra.mrb[8].mxu1 %v674_v33  ;;  %v3415_v33 = vld [vmem:[%s4026_s16 + $0x5a0] ss:$16 sps:$4 sm:$0xff]  }
 0x1dc   : > { %2338 = vmatpush1.bf16.msra.mxu0 %v3337_v34  ;;  %2502 = vmatpush1.bf16.msra.mxu1 %v3340_v7  ;;  %v3423_v34 = vld [vmem:[%s4026_s16 + $0x5c4] ss:$16 sps:$4 sm:$0xff]   ;;  %v3426_v7 = vld [vmem:[%s4026_s16 + $0x5cc] ss:$16 sps:$4 sm:$0xff]  }
 0x1dd   : > { %2339 = vmatprep.subr.bf16.mxu0 %v3345_v35  ;;  %2503 = vmatprep.subr.bf16.mxu1 %v3348_v36  ;;  %v617_v35 = vadd.f32 %v4133_v6, %v403_v32  ;;  %v3421_v36 = vld [vmem:[%s4026_s16 + $0x5c0] ss:$16 sps:$4 sm:$0xff]   ;;  %v3435_v6 = vld [vmem:[%s4026_s16 + $0x604] ss:$16 sps:$4 sm:$0xff]   ;;  %v3496_v32 = vld [vmem:[%s4026_s16 + $0x748] ss:$16 sps:$4 sm:$0xff]  }
 0x1de   : > { %2369 = vmatprep.mubr.bf16.mxu0 %v677_v38  ;;  %2533 = vmatprep.mubr.bf16.mxu1 %v677_v38  ;;  %v3424_v38 = vld [vmem:[%s4026_s16 + $0x5c8] ss:$16 sps:$4 sm:$0xff]  }
 0x1e0   : > { %2340 = vmatpush1.bf16.msra.mxu0 %v3343_v43  ;;  %2504 = vmatpush1.bf16.msra.mxu1 %v3346_v44  ;;  %v3429_v43 = vld [vmem:[%s4026_s16 + $0x5e4] ss:$16 sps:$4 sm:$0xff]   ;;  %v3432_v44 = vld [vmem:[%s4026_s16 + $0x5ec] ss:$16 sps:$4 sm:$0xff]  }
 0x1e1   : > { %2341 = vmatprep.subr.bf16.mxu0 %v3351_v45  ;;  %2505 = vmatprep.subr.bf16.mxu1 %v3354_v46  ;;  %v668_v45 = vmax.f32 %v617_v35, 0.0  ;;  %v3427_v46 = vld [vmem:[%s4026_s16 + $0x5e0] ss:$16 sps:$4 sm:$0xff]   ;;  %v3507_v35 = vld [vmem:[%s4026_s16 + $0x784] ss:$16 sps:$4 sm:$0xff]  }
 0x1e4   : > { %2342 = vmatpush1.bf16.msra.mxu0 %v3349_v48  ;;  %2506 = vmatpush1.bf16.msra.mxu1 %v3352_v49  ;;  %v3430_v48 = vld [vmem:[%s4026_s16 + $0x5e8] ss:$16 sps:$4 sm:$0xff]   ;;  %v3438_v49 = vld [vmem:[%s4026_s16 + $0x60c] ss:$16 sps:$4 sm:$0xff]  }
 0x1e5   : > { %2343 = vmatprep.subr.bf16.mxu0 %v3357_v50  ;;  %2507 = vmatprep.subr.bf16.mxu1 %v3360_v51  ;;  %v671_v50 = vmax.f32 %v4173_v47, 0.0  ;;  %v676_v51 = vpack.c.bf16 %v668_v45, %v668_v45  ;;  %v3439_v47 = vld [vmem:[%s4026_s16 + $0x620] ss:$16 sps:$4 sm:$0xff]   ;;  %v3516_v45 = vld [vmem:[%s4026_s16 + $0x7ac] ss:$16 sps:$4 sm:$0xff]  }
 0x1e8   : > { %2344 = vmatpush1.bf16.msra.mxu0 %v3355_v52  ;;  %2508 = vmatpush1.bf16.msra.mxu1 %v3358_v53  ;;  %v3433_v52 = vld [vmem:[%s4026_s16 + $0x600] ss:$16 sps:$4 sm:$0xff]   ;;  %v3436_v53 = vld [vmem:[%s4026_s16 + $0x608] ss:$16 sps:$4 sm:$0xff]  }
 0x1e9   : > { %2345 = vmatprep.subr.bf16.mxu0 %v3363_v55  ;;  %2509 = vmatprep.subr.bf16.mxu1 %v3366_v56  ;;  %v3441_v55 = vld [vmem:[%s4026_s16 + $0x624] ss:$16 sps:$4 sm:$0xff]   ;;  %v3444_v56 = vld [vmem:[%s4026_s16 + $0x62c] ss:$16 sps:$4 sm:$0xff]  }
 0x1ec   : > { %2346 = vmatpush1.bf16.msra.mxu0 %v3361_v57  ;;  %2510 = vmatpush1.bf16.msra.mxu1 %v3364_v58  ;;  %v679_v57 = vpack.c.bf16 %v671_v50, %v671_v50  ;;  %v3442_v58 = vld [vmem:[%s4026_s16 + $0x628] ss:$16 sps:$4 sm:$0xff]   ;;  %v3517_v50 = vld [vmem:[%s4026_s16 + $0x7c0] ss:$16 sps:$4 sm:$0xff]  }
 0x1ed   : > { %2347 = vmatprep.subr.bf16.mxu0 %v3369_v59  ;;  %2511 = vmatprep.subr.bf16.mxu1 %v3372_v60  ;;  %v3447_v59 = vld [vmem:[%s4026_s16 + $0x644] ss:$16 sps:$4 sm:$0xff]   ;;  %v3450_v60 = vld [vmem:[%s4026_s16 + $0x64c] ss:$16 sps:$4 sm:$0xff]  }
 0x1f0   : > { %2348 = vmatpush1.bf16.msra.mxu0 %v3367_v61  ;;  %2512 = vmatpush1.bf16.msra.mxu1 %v3370_v62  ;;  %v3445_v61 = vld [vmem:[%s4026_s16 + $0x640] ss:$16 sps:$4 sm:$0xff]   ;;  %v3448_v62 = vld [vmem:[%s4026_s16 + $0x648] ss:$16 sps:$4 sm:$0xff]  }
 0x1f1   : > { %2349 = vmatprep.subr.bf16.mxu0 %v3375_v63  ;;  %2513 = vmatprep.subr.bf16.mxu1 %v3378_v0  ;;  %v3453_v63 = vld [vmem:[%s4026_s16 + $0x664] ss:$16 sps:$4 sm:$0xff]   ;;  %v3456_v0 = vld [vmem:[%s4026_s16 + $0x66c] ss:$16 sps:$4 sm:$0xff]  }
 0x1f4   : > { %2350 = vmatpush1.bf16.msra.mxu0 %v3373_v1  ;;  %2514 = vmatpush1.bf16.msra.mxu1 %v3376_v2  ;;  %v3451_v1 = vld [vmem:[%s4026_s16 + $0x660] ss:$16 sps:$4 sm:$0xff]   ;;  %v3454_v2 = vld [vmem:[%s4026_s16 + $0x668] ss:$16 sps:$4 sm:$0xff]  }
 0x1f5   : > { %2351 = vmatprep.subr.bf16.mxu0 %v3381_v3  ;;  %2515 = vmatprep.subr.bf16.mxu1 %v3384_v4  ;;  %v3459_v3 = vld [vmem:[%s4026_s16 + $0x684] ss:$16 sps:$4 sm:$0xff]   ;;  %v3462_v4 = vld [vmem:[%s4026_s16 + $0x68c] ss:$16 sps:$4 sm:$0xff]  }
 0x1f8   : > { %2352 = vmatpush1.bf16.msra.mxu0 %v3379_v5  ;;  %2516 = vmatpush1.bf16.msra.mxu1 %v3382_v8  ;;  %v3457_v5 = vld [vmem:[%s4026_s16 + $0x680] ss:$16 sps:$4 sm:$0xff]   ;;  %v3460_v8 = vld [vmem:[%s4026_s16 + $0x688] ss:$16 sps:$4 sm:$0xff]  }
 0x1f9   : > { %2353 = vmatprep.subr.bf16.mxu0 %v3387_v9  ;;  %2517 = vmatprep.subr.bf16.mxu1 %v3390_v10  ;;  %v3465_v9 = vld [vmem:[%s4026_s16 + $0x6a4] ss:$16 sps:$4 sm:$0xff]   ;;  %v3468_v10 = vld [vmem:[%s4026_s16 + $0x6ac] ss:$16 sps:$4 sm:$0xff]  }
 0x1fc   : > { %2354 = vmatpush1.bf16.msra.mxu0 %v3385_v11  ;;  %2518 = vmatpush1.bf16.msra.mxu1 %v3388_v12  ;;  %v3463_v11 = vld [vmem:[%s4026_s16 + $0x6a0] ss:$16 sps:$4 sm:$0xff]   ;;  %v3466_v12 = vld [vmem:[%s4026_s16 + $0x6a8] ss:$16 sps:$4 sm:$0xff]  }
 0x1fd   : > { %2355 = vmatprep.subr.bf16.mxu0 %v3393_v13  ;;  %2519 = vmatprep.subr.bf16.mxu1 %v3396_v14  ;;  %v3471_v13 = vld [vmem:[%s4026_s16 + $0x6c4] ss:$16 sps:$4 sm:$0xff]   ;;  %v3474_v14 = vld [vmem:[%s4026_s16 + $0x6cc] ss:$16 sps:$4 sm:$0xff]  }
 0x200   : > { %2356 = vmatpush1.bf16.msra.mxu0 %v3391_v15  ;;  %2520 = vmatpush1.bf16.msra.mxu1 %v3394_v39  ;;  %v3469_v15 = vld [vmem:[%s4026_s16 + $0x6c0] ss:$16 sps:$4 sm:$0xff]   ;;  %v3472_v39 = vld [vmem:[%s4026_s16 + $0x6c8] ss:$16 sps:$4 sm:$0xff]  }
 0x201   : > { %2357 = vmatprep.subr.bf16.mxu0 %v3399_v16  ;;  %2521 = vmatprep.subr.bf16.mxu1 %v3402_v17  ;;  %v3477_v16 = vld [vmem:[%s4026_s16 + $0x6e4] ss:$16 sps:$4 sm:$0xff]   ;;  %v3480_v17 = vld [vmem:[%s4026_s16 + $0x6ec] ss:$16 sps:$4 sm:$0xff]  }
 0x204   : > { %2358 = vmatpush1.bf16.msra.mxu0 %v3397_v18  ;;  %2522 = vmatpush1.bf16.msra.mxu1 %v3400_v19  ;;  %v3475_v18 = vld [vmem:[%s4026_s16 + $0x6e0] ss:$16 sps:$4 sm:$0xff]   ;;  %v3478_v19 = vld [vmem:[%s4026_s16 + $0x6e8] ss:$16 sps:$4 sm:$0xff]  }
 0x205   : > { %2359 = vmatprep.subr.bf16.mxu0 %v3405_v20  ;;  %2523 = vmatprep.subr.bf16.mxu1 %v3408_v21  ;;  %v3483_v20 = vld [vmem:[%s4026_s16 + $0x704] ss:$16 sps:$4 sm:$0xff]   ;;  %v3486_v21 = vld [vmem:[%s4026_s16 + $0x70c] ss:$16 sps:$4 sm:$0xff]  }
 0x208   : > { %2360 = vmatpush1.bf16.msra.mxu0 %v3403_v24  ;;  %2524 = vmatpush1.bf16.msra.mxu1 %v3406_v25  ;;  %v3481_v24 = vld [vmem:[%s4026_s16 + $0x700] ss:$16 sps:$4 sm:$0xff]   ;;  %v3484_v25 = vld [vmem:[%s4026_s16 + $0x708] ss:$16 sps:$4 sm:$0xff]  }
 0x209   : > { %2361 = vmatprep.subr.bf16.mxu0 %v3411_v26  ;;  %2525 = vmatprep.subr.bf16.mxu1 %v3414_v27  ;;  %v3489_v26 = vld [vmem:[%s4026_s16 + $0x724] ss:$16 sps:$4 sm:$0xff]   ;;  %v3492_v27 = vld [vmem:[%s4026_s16 + $0x72c] ss:$16 sps:$4 sm:$0xff]  }
 0x20c   : > { %2362 = vmatpush1.bf16.msra.mxu0 %v3409_v54  ;;  %2526 = vmatpush1.bf16.msra.mxu1 %v3412_v29  ;;  %v3490_v54 = vld [vmem:[%s4026_s16 + $0x728] ss:$16 sps:$4 sm:$0xff]   ;;  %v3495_v29 = vld [vmem:[%s4026_s16 + $0x744] ss:$16 sps:$4 sm:$0xff]  }
 0x20d   : > { %2363 = vmatprep.subr.bf16.mxu0 %v3417_v30  ;;  %2527 = vmatprep.subr.bf16.mxu1 %v3420_v31  ;;  %v3498_v30 = vld [vmem:[%s4026_s16 + $0x74c] ss:$16 sps:$4 sm:$0xff]   ;;  %v3493_v31 = vld [vmem:[%s4026_s16 + $0x740] ss:$16 sps:$4 sm:$0xff]  }
 0x210   : > { %2364 = vmatpush1.bf16.msra.mxu0 %v3415_v33  ;;  %2528 = vmatpush1.bf16.msra.mxu1 %v3418_v23  ;;  %v3501_v33 = vld [vmem:[%s4026_s16 + $0x764] ss:$16 sps:$4 sm:$0xff]   ;;  %v3504_v23 = vld [vmem:[%s4026_s16 + $0x76c] ss:$16 sps:$4 sm:$0xff]  }
 0x211   : > { %2365 = vmatprep.subr.bf16.mxu0 %v3423_v34  ;;  %2529 = vmatprep.subr.bf16.mxu1 %v3426_v7  ;;  %v3499_v34 = vld [vmem:[%s4026_s16 + $0x760] ss:$16 sps:$4 sm:$0xff]   ;;  %v3502_v7 = vld [vmem:[%s4026_s16 + $0x768] ss:$16 sps:$4 sm:$0xff]  }
 0x214   : > { %2366 = vmatpush1.bf16.msra.mxu0 %v3421_v36  ;;  %2530 = vmatpush1.bf16.msra.mxu1 %v3424_v38  ;;  %v3510_v36 = vld [vmem:[%s4026_s16 + $0x78c] ss:$16 sps:$4 sm:$0xff]   ;;  %v3505_v38 = vld [vmem:[%s4026_s16 + $0x780] ss:$16 sps:$4 sm:$0xff]  }
 0x215   : > { %2367 = vmatprep.subr.bf16.mxu0 %v3429_v43  ;;  %2531 = vmatprep.subr.bf16.mxu1 %v3432_v44  ;;  %v3508_v43 = vld [vmem:[%s4026_s16 + $0x788] ss:$16 sps:$4 sm:$0xff]   ;;  %v3513_v44 = vld [vmem:[%s4026_s16 + $0x7a4] ss:$16 sps:$4 sm:$0xff]  }
 0x218   : > { %2368 = vmatpush1.bf16.msra.mxu0 %v3427_v46  ;;  %2532 = vmatpush1.bf16.msra.mxu1 %v3430_v48  ;;  %v3511_v46 = vld [vmem:[%s4026_s16 + $0x7a0] ss:$16 sps:$4 sm:$0xff]   ;;  %v3514_v48 = vld [vmem:[%s4026_s16 + $0x7a8] ss:$16 sps:$4 sm:$0xff]  }
 0x219   : > { %2378 = vmatprep.subr.bf16.mxu0 %v3435_v6  ;;  %2542 = vmatprep.subr.bf16.mxu1 %v3438_v49  ;;  %v3519_v6 = vld [vmem:[%s4026_s16 + $0x7c4] ss:$16 sps:$4 sm:$0xff]   ;;  %v3522_v49 = vld [vmem:[%s4026_s16 + $0x7cc] ss:$16 sps:$4 sm:$0xff]  }
 0x21b   : > { %2370 = vmatmul.mubr.bf16.vlgmr.msra.gmra.mrb[8].mxu0 %v676_v51  ;;  %2534 = vmatmul.mubr.bf16.vlgmr.msra.gmra.mrb[8].mxu1 %v676_v51  ;;  %v3520_v51 = vld [vmem:[%s4026_s16 + $0x7c8] ss:$16 sps:$4 sm:$0xff]  }
 0x21c   : > { %2379 = vmatpush1.bf16.msra.mxu0 %v3433_v52  ;;  %2543 = vmatpush1.bf16.msra.mxu1 %v3436_v53  ;;  %v3525_v52 = vld [vmem:[%s4026_s16 + $0x7e4] ss:$16 sps:$4 sm:$0xff]   ;;  %v3528_v53 = vld [vmem:[%s4026_s16 + $0x7ec] ss:$16 sps:$4 sm:$0xff]  }
 0x21d   : > { %2380 = vmatprep.subr.bf16.mxu0 %v3441_v55  ;;  %2544 = vmatprep.subr.bf16.mxu1 %v3444_v56  ;;  %v3523_v55 = vld [vmem:[%s4026_s16 + $0x7e0] ss:$16 sps:$4 sm:$0xff]   ;;  %v3526_v56 = vld [vmem:[%s4026_s16 + $0x7e8] ss:$16 sps:$4 sm:$0xff]  }
 0x21e   : > { %2410 = vmatprep.mubr.bf16.mxu0 %v679_v57  ;;  %2574 = vmatprep.mubr.bf16.mxu1 %v679_v57  ;;  %v670_v57 = vmax.f32 %v4168_v37, 0.0 }
 0x220   : > { %2381 = vmatpush1.bf16.msra.mxu0 %v3439_v47  ;;  %2545 = vmatpush1.bf16.msra.mxu1 %v3442_v58  ;;  %v678_v47 = vpack.c.bf16 %v670_v57, %v670_v57  ;;  %v936_v58 = vld [vmem:[%s286_s24] sm:$0xf] }
 0x221   : > { %2382 = vmatprep.subr.bf16.mxu0 %v3447_v59  ;;  %2546 = vmatprep.subr.bf16.mxu1 %v3450_v60  ;;  %v937_v59 = vunpack.c.l.bf16 %v936_v58 }
 0x223   : > { %v942_v60 = vrot.slane %v937_v59, %v4110_v40 }
 0x224   : > { %2383 = vmatpush1.bf16.msra.mxu0 %v3445_v61  ;;  %2547 = vmatpush1.bf16.msra.mxu1 %v3448_v62  ;;  %v950_v61 = vrot.slane %v937_v59, %v4150_v22  ;;  %v946_v62 = vrot.slane %v937_v59, %v4113_v41 }
 0x225   : > { %2384 = vmatprep.subr.bf16.mxu0 %v3453_v63  ;;  %2548 = vmatprep.subr.bf16.mxu1 %v3456_v0  ;;  %v954_v63 = vrot.slane %v937_v59, %v4116_v42  ;;  %v962_v37 = vrot.slane %v942_v60, %v4110_v40 }
 0x226   : > { %v970_v0 = vrot.slane %v950_v61, %v4110_v40 }
 0x228   : > { %2385 = vmatpush1.bf16.msra.mxu0 %v3451_v1  ;;  %2549 = vmatpush1.bf16.msra.mxu1 %v3454_v2  ;;  %v966_v1 = vrot.slane %v946_v62, %v4110_v40  ;;  %v974_v2 = vrot.slane %v954_v63, %v4110_v40 }
 0x229   : > { %2386 = vmatprep.subr.bf16.mxu0 %v3459_v3  ;;  %2550 = vmatprep.subr.bf16.mxu1 %v3462_v4 }
 0x22c   : > { %2387 = vmatpush1.bf16.msra.mxu0 %v3457_v5  ;;  %2551 = vmatpush1.bf16.msra.mxu1 %v3460_v8 }
 0x22d   : > { %2388 = vmatprep.subr.bf16.mxu0 %v3465_v9  ;;  %2552 = vmatprep.subr.bf16.mxu1 %v3468_v10 }
 0x230   : > { %2389 = vmatpush1.bf16.msra.mxu0 %v3463_v11  ;;  %2553 = vmatpush1.bf16.msra.mxu1 %v3466_v12 }
 0x231   : > { %2390 = vmatprep.subr.bf16.mxu0 %v3471_v13  ;;  %2554 = vmatprep.subr.bf16.mxu1 %v3474_v14 }
 0x234   : > { %2391 = vmatpush1.bf16.msra.mxu0 %v3469_v15  ;;  %2555 = vmatpush1.bf16.msra.mxu1 %v3472_v39 }
 0x235   : > { %2392 = vmatprep.subr.bf16.mxu0 %v3477_v16  ;;  %2556 = vmatprep.subr.bf16.mxu1 %v3480_v17 }
 0x238   : > { %2393 = vmatpush1.bf16.msra.mxu0 %v3475_v18  ;;  %2557 = vmatpush1.bf16.msra.mxu1 %v3478_v19 }
 0x239   : > { %2394 = vmatprep.subr.bf16.mxu0 %v3483_v20  ;;  %2558 = vmatprep.subr.bf16.mxu1 %v3486_v21 }
 0x23c   : > { %2395 = vmatpush1.bf16.msra.mxu0 %v3481_v24  ;;  %2559 = vmatpush1.bf16.msra.mxu1 %v3484_v25 }
 0x23d   : > { %2396 = vmatprep.subr.bf16.mxu0 %v3489_v26  ;;  %2560 = vmatprep.subr.bf16.mxu1 %v3492_v27 }
 0x240   : > { %2397 = vmatpush1.bf16.msra.mxu0 %v3487_v28  ;;  %2561 = vmatpush1.bf16.msra.mxu1 %v3490_v54 }
 0x241   : > { %2398 = vmatprep.subr.bf16.mxu0 %v3495_v29  ;;  %2562 = vmatprep.subr.bf16.mxu1 %v3498_v30 }
 0x244   : > { %2399 = vmatpush1.bf16.msra.mxu0 %v3493_v31  ;;  %2563 = vmatpush1.bf16.msra.mxu1 %v3496_v32 }
 0x245   : > { %2400 = vmatprep.subr.bf16.mxu0 %v3501_v33  ;;  %2564 = vmatprep.subr.bf16.mxu1 %v3504_v23 }
 0x248   : > { %2401 = vmatpush1.bf16.msra.mxu0 %v3499_v34  ;;  %2565 = vmatpush1.bf16.msra.mxu1 %v3502_v7 }
 0x249   : > { %2402 = vmatprep.subr.bf16.mxu0 %v3507_v35  ;;  %2566 = vmatprep.subr.bf16.mxu1 %v3510_v36 }
 0x24c   : > { %2403 = vmatpush1.bf16.msra.mxu0 %v3505_v38  ;;  %2567 = vmatpush1.bf16.msra.mxu1 %v3508_v43 }
 0x24d   : > { %2404 = vmatprep.subr.bf16.mxu0 %v3513_v44  ;;  %2568 = vmatprep.subr.bf16.mxu1 %v3516_v45 }
 0x250   : > { %2405 = vmatpush1.bf16.msra.mxu0 %v3511_v46  ;;  %2569 = vmatpush1.bf16.msra.mxu1 %v3514_v48 }
 0x251   : > { %2406 = vmatprep.subr.bf16.mxu0 %v3519_v6  ;;  %2570 = vmatprep.subr.bf16.mxu1 %v3522_v49 }
 0x254   : > { %2407 = vmatpush1.bf16.msra.mxu0 %v3517_v50  ;;  %2571 = vmatpush1.bf16.msra.mxu1 %v3520_v51 }
 0x255   : > { %2408 = vmatprep.subr.bf16.mxu0 %v3525_v52  ;;  %2572 = vmatprep.subr.bf16.mxu1 %v3528_v53 }
 0x258   : > { %2409 = vmatpush1.bf16.msra.mxu0 %v3523_v55  ;;  %2573 = vmatpush1.bf16.msra.mxu1 %v3526_v56 }
 0x25b   : > { %2411 = vmatmul.mubr.bf16.vlgmr.msra.gmra.mrb[8].mxu0 %v678_v47  ;;  %2575 = vmatmul.mubr.bf16.vlgmr.msra.gmra.mrb[8].mxu1 %v678_v47 }
 0x32e   : > { %v2412_v3 = vpop.f32.mrb[8].mxu0  ;;  %v2576_v4 = vpop.f32.mrb[8].mxu1 }
 0x32f   : > { %v3030_v5 = vadd.f32 %v2412_v3, %v962_v37  ;;  %v3032_v8 = vadd.f32 %v2576_v4, %v970_v0  ;;  %v2414_v9 = vpop.f32.mrb[9].mxu0  ;;  %v2578_v22 = vpop.f32.mrb[9].mxu1 }
 0x330   : > { %v3031_v10 = vadd.f32 %v2414_v9, %v966_v1  ;;  %v3033_v41 = vadd.f32 %v2578_v22, %v974_v2  ;;  %v2416_v11 = vpop.f32.mrb[10].mxu0  ;;  %v2580_v42 = vpop.f32.mrb[10].mxu1 }
 0x331   : > { %3529 = vtanh.f32 %v3030_v5  ;;  %v2417_v12 = vpop.f32.mrb[11].mxu0  ;;  %v2581_v13 = vpop.f32.mrb[11].mxu1 }
 0x332   : > { %3531 = vtanh.f32 %v3032_v8 }
 0x333   : > { %3533 = vtanh.f32 %v3031_v10 }
 0x334   : > { %3535 = vtanh.f32 %v3033_v41 }
 0x33b   : > { %v3530_v40 = vpop.eup %3529 }
 0x33c   : > { %v3532_v14 = vpop.eup %3531  ;;  %2587 = vst [vmem:[%s317_s17] sm:$0xff] %v3530_v40 }
 0x33d   : > { %v3534_v15 = vpop.eup %3533  ;;  %2589 = vst [vmem:[%s317_s17 + $0x10] sm:$0xff] %v3532_v14 }
 0x33e   : > { %v3536_v39 = vpop.eup %3535  ;;  %2588 = vst [vmem:[%s317_s17 + $0x8] sm:$0xff] %v3534_v15 }
 0x33f   : > { %2590 = vst [vmem:[%s317_s17 + $0x18] sm:$0xff] %v3536_v39 }
 0x340   : > { %3694 = shalt.err (!%p3691_p2)
}
 0x341   : > { %s3695_s6 = scalar_lea.hbm %s4367_s23, 512  ;;  %s3699_s25 = scalar_lea.hbm %s4416_s5, 1024 }
 0x342   : > { %p3696_p10 = scmp.ne.s32.totalorder %s4367_s23, %s3695_s6  ;;  %p3700_p5 = scmp.lt.u32.totalorder %s4367_s23, %s4416_s5 }
 0x343   : > { %p3701_p12 = scmp.lt.u32.totalorder %s3699_s25, %s3695_s6  ;;  %p3703_p3 = scmp.lt.u32.totalorder %s3695_s6, %s4367_s23 }
 0x344   : > { %p3697_p4 = pnand %p3696_p10, %p4460_p7 }
 0x345   : > { %p3702_p6 = por %p3701_p12, %p3700_p5 }
 0x346   : > { %p3698_p0 = pneg %p3697_p4 }
 0x347   : > { %p3704_p9 = por %p3703_p3, %p3702_p6 }
 0x349   : > { %p3705_p8 = pnand %p3704_p9, %p3698_p0 }
 0x34b   : > { %3708 = shalt.err (!%p3705_p8)
}
 0x34c   : > { %3074 = dma.vmem_to_hbm [thread:$0]  (%p4460_p7), %s4369_s18, 512, %s4367_s23, %s2592_s22  }
 0x34d PF: > { %s4461_s7 = sld [smem:[#allocation16_spill]]  ;;  %s4462_s11 = sld [smem:[#allocation19_spill]] }
 0x34e   : > { %p4464_p11 = scmp.ge.s32.totalorder %s3755_s21, 2 }
 0x353   : > { %s2618_s16 = sand.u32 1, %s4461_s7   ;;  %p4463_p13 = scmp.ne.s32.totalorder %s4462_s11, 0 }
 0x354   : > { %s2619_s29 = scalar_lea.sflag [#allocation4], %s2618_s16 }
 0x355   : > { %p3094_p1 = pnand %p4464_p11, %p4463_p13 }
 0x357   : > { %3738 = dma.done.wait (!%p3094_p1), %s2619_s29, 512  }
 0x358   : > { %3740 = vsyncadd (!%p3094_p1), %s2619_s29, 4294966784  ;;  %s4465_s21 = sld [smem:[#allocation17_spill]]  ;;  %s4466_s24 = sld [smem:[#allocation18_spill]] }
 0x359   : > { %s4467_s18 = smov %s3747_s19  ;;  %s4468_s19 = smov %s3751_s20 }
 0x35e   : > { %p20_p2 = scmp.ge.s32.totalorder %s4465_s21, 4   ;;  %s4469_s20 = smov %s4466_s24 }
 0x360   :  { %22 = sbr.rel (!%p20_p2) target bundleno = 10 (0xa), region = 109 }
 0x367   :  { %2624 = vsyncpa [#allocation3], 1 }
 0x368   :  { %2626 = vsyncpa [#allocation3 + $0x1], 1 }
 0x369   :  { %2627 = vsyncpa [#allocation6], 1 }
 0x36a   :  { %2628 = vsyncpa [#allocation9], 1 }
 0x36b   :  { %2630 = vsyncpa [#allocation9 + $0x1], 1 }
 0x36c   :  { %2631 = vsyncpa [#allocation4], 1 }
 0x36d   :  { %2633 = vsyncpa [#allocation4 + $0x1], 1 }

</bundles_post_ra>
